<compile_context>
chip_gen: v7x
topology: tpu7x:2x2x1
jax: 0.10.0
libtpu: 0.0.40
codegen_flags: <defaults>
</compile_context>

<pallas_src>
from functools import partial

import numpy as np
import jax
import jax.numpy as jnp
from jax import lax
from jax.experimental import pallas as pl
from jax.experimental.pallas import tpu as pltpu

_LANE = 128
_SUBLANE = 8
_VMEM_LIMIT = 48 * 1024 * 1024   # safe on v5e/v6e (128 MiB) and v7x (64 MiB)


def _round_up(x: int, m: int) -> int:
    return ((x + m - 1) // m) * m


def _mxu_dtype():
    """bf16 MXU operands on v6e/v7x (f32 accumulate); f32 on v5e and older."""
    try:
        kind = jax.devices()[0].device_kind.lower()
    except Exception:
        return jnp.float32
    if ("v6" in kind) or ("v7" in kind) or ("7x" in kind):
        return jnp.bfloat16
    return jnp.float32


# ---------------------------------------------------------------------------
# Kernel 1: LSTM recurrence (tanh(lstm_out) is produced directly).
# ---------------------------------------------------------------------------
def _lstm_recurrence_kernel(x_ref, w_ih_ref, w_hh_ref, b_ref, out_ref,
                            h_ref, c_ref, gx_ref):
    Tt, Bc, Ip = x_ref.shape
    Hp = h_ref.shape[1]

    # Reset carried state at the start of each batch chunk's time sweep.
    @pl.when(pl.program_id(1) == 0)
    def _():
        h_ref[...] = jnp.zeros_like(h_ref)
        c_ref[...] = jnp.zeros_like(c_ref)

    w_ih = w_ih_ref[...]          # (Ip, 4Hp)
    w_hh = w_hh_ref[...]          # (Hp, 4Hp)
    bias = b_ref[...]             # (1, 4Hp) == b_ih + b_hh (broadcast once/tile)

    # Input projection for the WHOLE time tile: one MXU-friendly matmul,
    # hoisted off the serial critical path.
    x_flat = x_ref[...].reshape(Tt * Bc, Ip)
    gx = jnp.dot(x_flat.astype(w_ih.dtype), w_ih,
                 preferred_element_type=jnp.float32) + bias
    gx_ref[...] = gx.reshape(Tt, Bc, 4 * Hp)

    def step(t, carry):
        h, c = carry
        gates = gx_ref[t] + jnp.dot(h.astype(w_hh.dtype), w_hh,
                                    preferred_element_type=jnp.float32)
        i_g = jax.nn.sigmoid(gates[:, 0 * Hp:1 * Hp])
        f_g = jax.nn.sigmoid(gates[:, 1 * Hp:2 * Hp])
        g_g = jnp.tanh(gates[:, 2 * Hp:3 * Hp])
        o_g = jax.nn.sigmoid(gates[:, 3 * Hp:4 * Hp])
        c_new = f_g * c + i_g * g_g
        h_new = o_g * jnp.tanh(c_new)
        out_ref[t] = jnp.tanh(h_new)          # torch.tanh(lstm_out)
        return h_new, c_new

    h_fin, c_fin = lax.fori_loop(0, Tt, step, (h_ref[...], c_ref[...]),
                                 unroll=True)
    h_ref[...] = h_fin
    c_ref[...] = c_fin


# ---------------------------------------------------------------------------
# Kernel 2: classifier head (linear + softmax + argmax), vectorized over T*B.
# ---------------------------------------------------------------------------
def _classifier_head_kernel(h_ref, w_ref, b_ref, probs_ref, cls_ref):
    Tt, Bp, Hp = h_ref.shape
    Cp = w_ref.shape[1]

    w = w_ref[...]                             # (Hp, Cp)
    x = h_ref[...].reshape(Tt * Bp, Hp)
    logits = (jnp.dot(x.astype(w.dtype), w,
                      preferred_element_type=jnp.float32)
              + b_ref[...]).reshape(Tt, Bp, Cp)   # padded classes get -1e30 bias

    m = jnp.max(logits, axis=-1, keepdims=True)
    e = jnp.exp(logits - m)
    denom = jnp.sum(e, axis=-1, keepdims=True)
    probs_ref[...] = e * pl.reciprocal(denom, approx=True)

    # argmax straight from the logits (reuses m; identical to argmax of probs)
    iota = lax.broadcasted_iota(jnp.int32, (Tt, Bp, Cp), 2)
    cls_ref[...] = jnp.min(jnp.where(logits >= m, iota, jnp.int32(Cp)), axis=-1)


# ---------------------------------------------------------------------------
# Padded, tiled forward (jitted).  Returns batch-first, unpadded arrays.
# ---------------------------------------------------------------------------
@partial(jax.jit, static_argnames=("hidden_size", "num_classes", "time_tile"))
def _analyser_forward(x, w_ih_p, w_hh_p, b_p, w_cls_p, b_cls_p,
                      *, hidden_size, num_classes, time_tile):
    B, T, I = x.shape
    Ip, G = w_ih_p.shape
    Hp = w_hh_p.shape[0]
    Cp = w_cls_p.shape[1]
    H, C = hidden_size, num_classes

    Tt = time_tile
    Tp = _round_up(T, Tt)
    Bc = min(_round_up(B, _SUBLANE), 64)     # batch chunk (megacore-shardable)
    Bp = _round_up(B, Bc)
    n_t = Tp // Tt
    n_b = Bp // Bc

    x_tm = jnp.transpose(x, (1, 0, 2)).astype(jnp.float32)          # (T, B, I)
    x_tm = jnp.pad(x_tm, ((0, Tp - T), (0, Bp - B), (0, Ip - I)))   # (Tp,Bp,Ip)

    lstm_out_p = pl.pallas_call(
        _lstm_recurrence_kernel,
        out_shape=jax.ShapeDtypeStruct((Tp, Bp, Hp), jnp.float32),
        grid_spec=pltpu.PrefetchScalarGridSpec(
            num_scalar_prefetch=0,
            grid=(n_b, n_t),
            in_specs=[
                pl.BlockSpec((Tt, Bc, Ip), lambda b, t: (t, b, 0)),   # x
                pl.BlockSpec((Ip, G), lambda b, t: (0, 0)),           # W_ih^T
                pl.BlockSpec((Hp, G), lambda b, t: (0, 0)),           # W_hh^T
                pl.BlockSpec((1, G), lambda b, t: (0, 0)),            # bias
            ],
            out_specs=pl.BlockSpec((Tt, Bc, Hp), lambda b, t: (t, b, 0)),
            scratch_shapes=[
                pltpu.VMEM((Bc, Hp), jnp.float32),        # h carry
                pltpu.VMEM((Bc, Hp), jnp.float32),        # c carry
                pltpu.VMEM((Tt, Bc, G), jnp.float32),     # gates_x tile
            ]),
        compiler_params=pltpu.CompilerParams(
            dimension_semantics=("parallel", "arbitrary"),
            vmem_limit_bytes=_VMEM_LIMIT),
    )(x_tm, w_ih_p, w_hh_p, b_p)

    probs_p, cls_p = pl.pallas_call(
        _classifier_head_kernel,
        out_shape=(jax.ShapeDtypeStruct((Tp, Bp, Cp), jnp.float32),
                   jax.ShapeDtypeStruct((Tp, Bp), jnp.int32)),
        grid_spec=pltpu.PrefetchScalarGridSpec(
            num_scalar_prefetch=0,
            grid=(n_t,),
            in_specs=[
                pl.BlockSpec((Tt, Bp, Hp), lambda t: (t, 0, 0)),
                pl.BlockSpec((Hp, Cp), lambda t: (0, 0)),
                pl.BlockSpec((1, Cp), lambda t: (0, 0)),
            ],
            out_specs=(pl.BlockSpec((Tt, Bp, Cp), lambda t: (t, 0, 0)),
                       pl.BlockSpec((Tt, Bp), lambda t: (t, 0)))),
        compiler_params=pltpu.CompilerParams(
            dimension_semantics=("parallel",),
            vmem_limit_bytes=_VMEM_LIMIT),
    )(lstm_out_p, w_cls_p, b_cls_p)

    lstm_out = jnp.transpose(lstm_out_p[:T, :B, :H], (1, 0, 2))   # (B, T, H)
    probs = jnp.transpose(probs_p[:T, :B, :C], (1, 0, 2))         # (B, T, C)
    cls = jnp.transpose(cls_p[:T, :B], (1, 0)).astype(jnp.int32)  # (B, T)
    return lstm_out, probs, cls


# ---------------------------------------------------------------------------
# Public wrapper (mirrors PyTorchAnalyserLSTM, batch_first=True LSTM).
# ---------------------------------------------------------------------------
class PallasAnalyserLSTM:
    def __init__(self, class_names, input_size, hidden_size, key,
                 time_tile=8):
        self._class_names = list(dict.fromkeys(str(x) for x in class_names))
        self.input_size = int(input_size)
        self.hidden_size = int(hidden_size)
        self._time_tile = int(time_tile)

        C = len(self._class_names)
        H, I = self.hidden_size, self.input_size
        k = 1.0 / np.sqrt(H)
        ks = jax.random.split(key, 6)

        # PyTorch LSTM / Linear init: uniform(-1/sqrt(H), 1/sqrt(H))
        self.w_ih = jax.random.uniform(ks[0], (4 * H, I), jnp.float32, -k, k)
        self.w_hh = jax.random.uniform(ks[1], (4 * H, H), jnp.float32, -k, k)
        self.b_ih = jax.random.uniform(ks[2], (4 * H,), jnp.float32, -k, k)
        self.b_hh = jax.random.uniform(ks[3], (4 * H,), jnp.float32, -k, k)
        if C == 1:
            # reference uses a constant classifier: any constant logit works
            self.w_cls = jnp.zeros((1, H), jnp.float32)
            self.b_cls = jnp.zeros((1,), jnp.float32)
        else:
            self.w_cls = jax.random.uniform(ks[4], (C, H), jnp.float32, -k, k)
            self.b_cls = jax.random.uniform(ks[5], (C,), jnp.float32, -k, k)

        # ---- padded / transposed kernel parameters --------------------------
        Hp = _round_up(H, _LANE)
        Ip = _round_up(I, _LANE)
        Cp = _round_up(C, _LANE)
        mxu_dt = _mxu_dtype()

        w_ih_4 = self.w_ih.reshape(4, H, I)
        w_ih_p = jnp.zeros((4, Hp, Ip), jnp.float32).at[:, :H, :I].set(w_ih_4)
        self._w_ih_p = jnp.transpose(w_ih_p.reshape(4 * Hp, Ip)).astype(mxu_dt)

        w_hh_4 = self.w_hh.reshape(4, H, H)
        w_hh_p = jnp.zeros((4, Hp, Hp), jnp.float32).at[:, :H, :H].set(w_hh_4)
        self._w_hh_p = jnp.transpose(w_hh_p.reshape(4 * Hp, Hp)).astype(mxu_dt)

        b4 = (self.b_ih + self.b_hh).reshape(4, H)
        b_p = jnp.zeros((4, Hp), jnp.float32).at[:, :H].set(b4)
        self._b_p = b_p.reshape(1, 4 * Hp)

        w_cls_p = jnp.zeros((Cp, Hp), jnp.float32).at[:C, :H].set(self.w_cls)
        self._w_cls_p = jnp.transpose(w_cls_p).astype(mxu_dt)        # (Hp, Cp)
        # padded classes get a -1e30 bias so softmax/argmax ignore them
        b_cls_p = jnp.full((Cp,), -1e30, jnp.float32).at[:C].set(self.b_cls)
        self._b_cls_p = b_cls_p.reshape(1, Cp)

    @property
    def class_names(self):
        return self._class_names

    def forward_arrays(self, inputs):
        """Returns (tanh(lstm_out), class_probabilities, classifications)."""
        return _analyser_forward(
            inputs, self._w_ih_p, self._w_hh_p, self._b_p,
            self._w_cls_p, self._b_cls_p,
            hidden_size=self.hidden_size,
            num_classes=len(self._class_names),
            time_tile=self._time_tile)

    def __call__(self, inputs):
        # inputs: (B, T, I), batch_first
        lstm_out, _probs, cls = self.forward_arrays(inputs)
        lstm_out, cls = jax.block_until_ready((lstm_out, cls))
        # TODO(synk): torch-style boolean advanced indexing (dynamic output
        # shapes per class) has no static-shape Pallas/JAX equivalent; done on
        # host with NumPy exactly like the reference's lstm_out[cls == i].
        lstm_out_np = np.asarray(lstm_out)
        cls_np = np.asarray(cls)
        return {name: {'content': lstm_out_np[cls_np == i]}
                for i, name in enumerate(self._class_names)}


# ---------------------------------------------------------------------------
# Pure-JAX f32 reference (for correctness checking only).
# ---------------------------------------------------------------------------
def _reference_forward(x, w_ih, w_hh, b_ih, b_hh, w_cls, b_cls):
    B, T, _ = x.shape
    H = w_hh.shape[1]
    h = jnp.zeros((B, H), jnp.float32)
    c = jnp.zeros((B, H), jnp.float32)
    outs = []
    for t in range(T):
        gates = x[:, t, :] @ w_ih.T + h @ w_hh.T + b_ih + b_hh
        i_g = jax.nn.sigmoid(gates[:, 0:H])
        f_g = jax.nn.sigmoid(gates[:, H:2 * H])
        g_g = jnp.tanh(gates[:, 2 * H:3 * H])
        o_g = jax.nn.sigmoid(gates[:, 3 * H:4 * H])
        c = f_g * c + i_g * g_g
        h = o_g * jnp.tanh(c)
        outs.append(jnp.tanh(h))
    lstm_out = jnp.stack(outs, axis=1)
    logits = lstm_out @ w_cls.T + b_cls
    probs = jax.nn.softmax(logits, axis=-1)
    cls = jnp.argmax(probs, axis=-1)
    return lstm_out, probs, cls


if __name__ == "__main__":
    B, T, I, H = 2, 8, 16, 32
    class_names = ["alpha", "beta", "gamma"]

    root = jax.random.PRNGKey(0)
    k_param, k_x = jax.random.split(root)

    model = PallasAnalyserLSTM(class_names, input_size=I, hidden_size=H,
                               key=k_param)
    x = jax.random.normal(k_x, (B, T, I), jnp.float32)

    lstm_out, probs, cls = model.forward_arrays(x)
    jax.block_until_ready((lstm_out, probs, cls))

    # correctness vs pure-JAX f32 reference (loose tol covers bf16 MXU path)
    ref_out, ref_probs, _ref_cls = _reference_forward(
        x, model.w_ih, model.w_hh, model.b_ih, model.b_hh,
        model.w_cls, model.b_cls)
    assert np.allclose(np.asarray(lstm_out), np.asarray(ref_out),
                       atol=8e-2), "lstm_out mismatch vs reference"
    assert np.allclose(np.asarray(probs), np.asarray(ref_probs),
                       atol=8e-2), "probs mismatch vs reference"
    assert np.asarray(cls).min() >= 0 and np.asarray(cls).max() < len(class_names)

    out = model(x)
    total = sum(out[name]['content'].shape[0] for name in class_names)
    assert total == B * T
    for name in class_names:
        arr = out[name]['content']
        assert arr.ndim == 2 and arr.shape[1] == H

    print("KERNEL_OK")
</pallas_src>

<mosaic_0001>
module attributes {stable_mosaic.version = 11 : i64} {
  func.func @_lstm_recurrence_kernel(%arg0: i32, %arg1: i32, %arg2: memref<8x8x128xf32, #tpu.memory_space<vmem>>, %arg3: memref<128x512xf32, #tpu.memory_space<vmem>>, %arg4: memref<128x512xf32, #tpu.memory_space<vmem>>, %arg5: memref<1x512xf32, #tpu.memory_space<vmem>>, %arg6: memref<8x8x128xf32, #tpu.memory_space<vmem>>, %arg7: memref<8x128xf32, #tpu.memory_space<vmem>>, %arg8: memref<8x128xf32, #tpu.memory_space<vmem>>, %arg9: memref<8x8x512xf32, #tpu.memory_space<vmem>>) attributes {dimension_semantics = [#tpu.dimension_semantics<parallel>, #tpu.dimension_semantics<arbitrary>], iteration_bounds = array<i64: 1, 1>, scalar_prefetch = 0 : i64, scratch_operands = 3 : i64, tpu.core_type = #tpu.core_type<tc>, window_params = [{transform_indices = @transform_0, window_bounds = array<i64: 8, 8, 128>}, {pipeline_mode = #tpu.pipeline_mode<synchronous>, transform_indices = @transform_1, window_bounds = array<i64: 128, 512>}, {pipeline_mode = #tpu.pipeline_mode<synchronous>, transform_indices = @transform_2, window_bounds = array<i64: 128, 512>}, {pipeline_mode = #tpu.pipeline_mode<synchronous>, transform_indices = @transform_3, window_bounds = array<i64: 1, 512>}, {transform_indices = @transform_4, window_bounds = array<i64: 8, 8, 128>}]} {
    %c0_i32 = arith.constant 0 : i32
    %0 = arith.cmpi eq, %arg1, %c0_i32 : i32
    %1 = arith.extui %0 : i1 to i32
    %c0_i32_0 = arith.constant 0 : i32
    %2 = arith.cmpi ne, %1, %c0_i32_0 : i32
    scf.if %2 {
      %cst_85 = arith.constant 0.000000e+00 : f32
      %297 = vector.broadcast %cst_85 : f32 to vector<8x128xf32>
      %c0_86 = arith.constant 0 : index
      %c0_87 = arith.constant 0 : index
      %298 = vector.load %arg7[%c0_86, %c0_87] : memref<8x128xf32, #tpu.memory_space<vmem>>, vector<8x128xf32>
      tpu.vector_store %arg7[%c0_86, %c0_87], %297 {strides = array<i32>} : memref<8x128xf32, #tpu.memory_space<vmem>>, vector<8x128xf32>,
      %cst_88 = arith.constant 0.000000e+00 : f32
      %299 = vector.broadcast %cst_88 : f32 to vector<8x128xf32>
      %c0_89 = arith.constant 0 : index
      %c0_90 = arith.constant 0 : index
      %300 = vector.load %arg8[%c0_89, %c0_90] : memref<8x128xf32, #tpu.memory_space<vmem>>, vector<8x128xf32>
      tpu.vector_store %arg8[%c0_89, %c0_90], %299 {strides = array<i32>} : memref<8x128xf32, #tpu.memory_space<vmem>>, vector<8x128xf32>,
    } else {
    }
    %c0 = arith.constant 0 : index
    %c0_1 = arith.constant 0 : index
    %3 = vector.load %arg3[%c0, %c0_1] : memref<128x512xf32, #tpu.memory_space<vmem>>, vector<128x512xf32>
    %c0_2 = arith.constant 0 : index
    %c0_3 = arith.constant 0 : index
    %4 = vector.load %arg4[%c0_2, %c0_3] : memref<128x512xf32, #tpu.memory_space<vmem>>, vector<128x512xf32>
    %c0_4 = arith.constant 0 : index
    %c0_5 = arith.constant 0 : index
    %5 = vector.load %arg5[%c0_4, %c0_5] : memref<1x512xf32, #tpu.memory_space<vmem>>, vector<1x512xf32>
    %c0_6 = arith.constant 0 : index
    %c0_7 = arith.constant 0 : index
    %c0_8 = arith.constant 0 : index
    %6 = vector.load %arg2[%c0_6, %c0_7, %c0_8] : memref<8x8x128xf32, #tpu.memory_space<vmem>>, vector<8x8x128xf32>
    %7 = vector.shape_cast %6 : vector<8x8x128xf32> to vector<64x128xf32>
    %cst = arith.constant dense<0.000000e+00> : vector<64x512xf32>
    %8 = tpu.matmul %7, %3, %cst {dimension_numbers = #tpu.dot_dimension_numbers<[1], [0], [0], [1], [0, 0, 1, 1], [], []>} : vector<64x128xf32>, vector<128x512xf32>, vector<64x512xf32> -> vector<64x512xf32>
    %9 = vector.broadcast %5 : vector<1x512xf32> to vector<64x512xf32>
    %10 = arith.addf %8, %9 : vector<64x512xf32>
    %11 = vector.shape_cast %10 : vector<64x512xf32> to vector<8x8x512xf32>
    %c0_9 = arith.constant 0 : index
    %c0_10 = arith.constant 0 : index
    %c0_11 = arith.constant 0 : index
    %12 = vector.load %arg9[%c0_9, %c0_10, %c0_11] : memref<8x8x512xf32, #tpu.memory_space<vmem>>, vector<8x8x512xf32>
    tpu.vector_store %arg9[%c0_9, %c0_10, %c0_11], %11 {strides = array<i32>} : memref<8x8x512xf32, #tpu.memory_space<vmem>>, vector<8x8x512xf32>,
    %c0_12 = arith.constant 0 : index
    %c0_13 = arith.constant 0 : index
    %13 = vector.load %arg7[%c0_12, %c0_13] : memref<8x128xf32, #tpu.memory_space<vmem>>, vector<8x128xf32>
    %c0_14 = arith.constant 0 : index
    %c0_15 = arith.constant 0 : index
    %14 = vector.load %arg8[%c0_14, %c0_15] : memref<8x128xf32, #tpu.memory_space<vmem>>, vector<8x128xf32>
    %c0_i32_16 = arith.constant 0 : i32
    %15 = arith.index_cast %c0_i32_16 : i32 to index
    %c0_17 = arith.constant 0 : index
    %c0_18 = arith.constant 0 : index
    %16 = vector.load %arg9[%15, %c0_17, %c0_18] : memref<8x8x512xf32, #tpu.memory_space<vmem>>, vector<1x8x512xf32>
    %17 = vector.shape_cast %16 : vector<1x8x512xf32> to vector<8x512xf32>
    %cst_19 = arith.constant dense<0.000000e+00> : vector<8x512xf32>
    %18 = tpu.matmul %13, %4, %cst_19 {dimension_numbers = #tpu.dot_dimension_numbers<[1], [0], [0], [1], [0, 0, 1, 1], [], []>} : vector<8x128xf32>, vector<128x512xf32>, vector<8x512xf32> -> vector<8x512xf32>
    %19 = arith.addf %17, %18 : vector<8x512xf32>
    %20 = vector.extract_strided_slice %19 {offsets = [0, 0], sizes = [8, 128], strides = [1, 1]} : vector<8x512xf32> to vector<8x128xf32>
    %21 = arith.negf %20 : vector<8x128xf32>
    %22 = math.exp %21 : vector<8x128xf32>
    %cst_20 = arith.constant 1.000000e+00 : f32
    %23 = vector.broadcast %cst_20 : f32 to vector<8x128xf32>
    %24 = arith.addf %23, %22 : vector<8x128xf32>
    %25 = arith.divf %23, %24 : vector<8x128xf32>
    %26 = vector.extract_strided_slice %19 {offsets = [0, 128], sizes = [8, 128], strides = [1, 1]} : vector<8x512xf32> to vector<8x128xf32>
    %27 = arith.negf %26 : vector<8x128xf32>
    %28 = math.exp %27 : vector<8x128xf32>
    %cst_21 = arith.constant 1.000000e+00 : f32
    %29 = vector.broadcast %cst_21 : f32 to vector<8x128xf32>
    %30 = arith.addf %29, %28 : vector<8x128xf32>
    %31 = arith.divf %29, %30 : vector<8x128xf32>
    %32 = vector.extract_strided_slice %19 {offsets = [0, 256], sizes = [8, 128], strides = [1, 1]} : vector<8x512xf32> to vector<8x128xf32>
    %33 = math.tanh %32 : vector<8x128xf32>
    %34 = vector.extract_strided_slice %19 {offsets = [0, 384], sizes = [8, 128], strides = [1, 1]} : vector<8x512xf32> to vector<8x128xf32>
    %35 = arith.negf %34 : vector<8x128xf32>
    %36 = math.exp %35 : vector<8x128xf32>
    %cst_22 = arith.constant 1.000000e+00 : f32
    %37 = vector.broadcast %cst_22 : f32 to vector<8x128xf32>
    %38 = arith.addf %37, %36 : vector<8x128xf32>
    %39 = arith.divf %37, %38 : vector<8x128xf32>
    %40 = arith.mulf %31, %14 : vector<8x128xf32>
    %41 = arith.mulf %25, %33 : vector<8x128xf32>
    %42 = arith.addf %40, %41 : vector<8x128xf32>
    %43 = math.tanh %42 : vector<8x128xf32>
    %44 = arith.mulf %39, %43 : vector<8x128xf32>
    %45 = math.tanh %44 : vector<8x128xf32>
    %46 = arith.index_cast %c0_i32_16 : i32 to index
    %c0_23 = arith.constant 0 : index
    %c0_24 = arith.constant 0 : index
    %47 = vector.load %arg6[%46, %c0_23, %c0_24] : memref<8x8x128xf32, #tpu.memory_space<vmem>>, vector<1x8x128xf32>
    %48 = vector.shape_cast %47 : vector<1x8x128xf32> to vector<8x128xf32>
    %49 = vector.shape_cast %45 : vector<8x128xf32> to vector<1x8x128xf32>
    tpu.vector_store %arg6[%46, %c0_23, %c0_24], %49 {strides = array<i32>} : memref<8x8x128xf32, #tpu.memory_space<vmem>>, vector<1x8x128xf32>,
    %c1_i32 = arith.constant 1 : i32
    %50 = arith.index_cast %c1_i32 : i32 to index
    %c0_25 = arith.constant 0 : index
    %c0_26 = arith.constant 0 : index
    %51 = vector.load %arg9[%50, %c0_25, %c0_26] : memref<8x8x512xf32, #tpu.memory_space<vmem>>, vector<1x8x512xf32>
    %52 = vector.shape_cast %51 : vector<1x8x512xf32> to vector<8x512xf32>
    %cst_27 = arith.constant dense<0.000000e+00> : vector<8x512xf32>
    %53 = tpu.matmul %44, %4, %cst_27 {dimension_numbers = #tpu.dot_dimension_numbers<[1], [0], [0], [1], [0, 0, 1, 1], [], []>} : vector<8x128xf32>, vector<128x512xf32>, vector<8x512xf32> -> vector<8x512xf32>
    %54 = arith.addf %52, %53 : vector<8x512xf32>
    %55 = vector.extract_strided_slice %54 {offsets = [0, 0], sizes = [8, 128], strides = [1, 1]} : vector<8x512xf32> to vector<8x128xf32>
    %56 = arith.negf %55 : vector<8x128xf32>
    %57 = math.exp %56 : vector<8x128xf32>
    %cst_28 = arith.constant 1.000000e+00 : f32
    %58 = vector.broadcast %cst_28 : f32 to vector<8x128xf32>
    %59 = arith.addf %58, %57 : vector<8x128xf32>
    %60 = arith.divf %58, %59 : vector<8x128xf32>
    %61 = vector.extract_strided_slice %54 {offsets = [0, 128], sizes = [8, 128], strides = [1, 1]} : vector<8x512xf32> to vector<8x128xf32>
    %62 = arith.negf %61 : vector<8x128xf32>
    %63 = math.exp %62 : vector<8x128xf32>
    %cst_29 = arith.constant 1.000000e+00 : f32
    %64 = vector.broadcast %cst_29 : f32 to vector<8x128xf32>
    %65 = arith.addf %64, %63 : vector<8x128xf32>
    %66 = arith.divf %64, %65 : vector<8x128xf32>
    %67 = vector.extract_strided_slice %54 {offsets = [0, 256], sizes = [8, 128], strides = [1, 1]} : vector<8x512xf32> to vector<8x128xf32>
    %68 = math.tanh %67 : vector<8x128xf32>
    %69 = vector.extract_strided_slice %54 {offsets = [0, 384], sizes = [8, 128], strides = [1, 1]} : vector<8x512xf32> to vector<8x128xf32>
    %70 = arith.negf %69 : vector<8x128xf32>
    %71 = math.exp %70 : vector<8x128xf32>
    %cst_30 = arith.constant 1.000000e+00 : f32
    %72 = vector.broadcast %cst_30 : f32 to vector<8x128xf32>
    %73 = arith.addf %72, %71 : vector<8x128xf32>
    %74 = arith.divf %72, %73 : vector<8x128xf32>
    %75 = arith.mulf %66, %42 : vector<8x128xf32>
    %76 = arith.mulf %60, %68 : vector<8x128xf32>
    %77 = arith.addf %75, %76 : vector<8x128xf32>
    %78 = math.tanh %77 : vector<8x128xf32>
    %79 = arith.mulf %74, %78 : vector<8x128xf32>
    %80 = math.tanh %79 : vector<8x128xf32>
    %81 = arith.index_cast %c1_i32 : i32 to index
    %c0_31 = arith.constant 0 : index
    %c0_32 = arith.constant 0 : index
    %82 = vector.load %arg6[%81, %c0_31, %c0_32] : memref<8x8x128xf32, #tpu.memory_space<vmem>>, vector<1x8x128xf32>
    %83 = vector.shape_cast %82 : vector<1x8x128xf32> to vector<8x128xf32>
    %84 = vector.shape_cast %80 : vector<8x128xf32> to vector<1x8x128xf32>
    tpu.vector_store %arg6[%81, %c0_31, %c0_32], %84 {strides = array<i32>} : memref<8x8x128xf32, #tpu.memory_space<vmem>>, vector<1x8x128xf32>,
    %c2_i32 = arith.constant 2 : i32
    %85 = arith.index_cast %c2_i32 : i32 to index
    %c0_33 = arith.constant 0 : index
    %c0_34 = arith.constant 0 : index
    %86 = vector.load %arg9[%85, %c0_33, %c0_34] : memref<8x8x512xf32, #tpu.memory_space<vmem>>, vector<1x8x512xf32>
    %87 = vector.shape_cast %86 : vector<1x8x512xf32> to vector<8x512xf32>
    %cst_35 = arith.constant dense<0.000000e+00> : vector<8x512xf32>
    %88 = tpu.matmul %79, %4, %cst_35 {dimension_numbers = #tpu.dot_dimension_numbers<[1], [0], [0], [1], [0, 0, 1, 1], [], []>} : vector<8x128xf32>, vector<128x512xf32>, vector<8x512xf32> -> vector<8x512xf32>
    %89 = arith.addf %87, %88 : vector<8x512xf32>
    %90 = vector.extract_strided_slice %89 {offsets = [0, 0], sizes = [8, 128], strides = [1, 1]} : vector<8x512xf32> to vector<8x128xf32>
    %91 = arith.negf %90 : vector<8x128xf32>
    %92 = math.exp %91 : vector<8x128xf32>
    %cst_36 = arith.constant 1.000000e+00 : f32
    %93 = vector.broadcast %cst_36 : f32 to vector<8x128xf32>
    %94 = arith.addf %93, %92 : vector<8x128xf32>
    %95 = arith.divf %93, %94 : vector<8x128xf32>
    %96 = vector.extract_strided_slice %89 {offsets = [0, 128], sizes = [8, 128], strides = [1, 1]} : vector<8x512xf32> to vector<8x128xf32>
    %97 = arith.negf %96 : vector<8x128xf32>
    %98 = math.exp %97 : vector<8x128xf32>
    %cst_37 = arith.constant 1.000000e+00 : f32
    %99 = vector.broadcast %cst_37 : f32 to vector<8x128xf32>
    %100 = arith.addf %99, %98 : vector<8x128xf32>
    %101 = arith.divf %99, %100 : vector<8x128xf32>
    %102 = vector.extract_strided_slice %89 {offsets = [0, 256], sizes = [8, 128], strides = [1, 1]} : vector<8x512xf32> to vector<8x128xf32>
    %103 = math.tanh %102 : vector<8x128xf32>
    %104 = vector.extract_strided_slice %89 {offsets = [0, 384], sizes = [8, 128], strides = [1, 1]} : vector<8x512xf32> to vector<8x128xf32>
    %105 = arith.negf %104 : vector<8x128xf32>
    %106 = math.exp %105 : vector<8x128xf32>
    %cst_38 = arith.constant 1.000000e+00 : f32
    %107 = vector.broadcast %cst_38 : f32 to vector<8x128xf32>
    %108 = arith.addf %107, %106 : vector<8x128xf32>
    %109 = arith.divf %107, %108 : vector<8x128xf32>
    %110 = arith.mulf %101, %77 : vector<8x128xf32>
    %111 = arith.mulf %95, %103 : vector<8x128xf32>
    %112 = arith.addf %110, %111 : vector<8x128xf32>
    %113 = math.tanh %112 : vector<8x128xf32>
    %114 = arith.mulf %109, %113 : vector<8x128xf32>
    %115 = math.tanh %114 : vector<8x128xf32>
    %116 = arith.index_cast %c2_i32 : i32 to index
    %c0_39 = arith.constant 0 : index
    %c0_40 = arith.constant 0 : index
    %117 = vector.load %arg6[%116, %c0_39, %c0_40] : memref<8x8x128xf32, #tpu.memory_space<vmem>>, vector<1x8x128xf32>
    %118 = vector.shape_cast %117 : vector<1x8x128xf32> to vector<8x128xf32>
    %119 = vector.shape_cast %115 : vector<8x128xf32> to vector<1x8x128xf32>
    tpu.vector_store %arg6[%116, %c0_39, %c0_40], %119 {strides = array<i32>} : memref<8x8x128xf32, #tpu.memory_space<vmem>>, vector<1x8x128xf32>,
    %c3_i32 = arith.constant 3 : i32
    %120 = arith.index_cast %c3_i32 : i32 to index
    %c0_41 = arith.constant 0 : index
    %c0_42 = arith.constant 0 : index
    %121 = vector.load %arg9[%120, %c0_41, %c0_42] : memref<8x8x512xf32, #tpu.memory_space<vmem>>, vector<1x8x512xf32>
    %122 = vector.shape_cast %121 : vector<1x8x512xf32> to vector<8x512xf32>
    %cst_43 = arith.constant dense<0.000000e+00> : vector<8x512xf32>
    %123 = tpu.matmul %114, %4, %cst_43 {dimension_numbers = #tpu.dot_dimension_numbers<[1], [0], [0], [1], [0, 0, 1, 1], [], []>} : vector<8x128xf32>, vector<128x512xf32>, vector<8x512xf32> -> vector<8x512xf32>
    %124 = arith.addf %122, %123 : vector<8x512xf32>
    %125 = vector.extract_strided_slice %124 {offsets = [0, 0], sizes = [8, 128], strides = [1, 1]} : vector<8x512xf32> to vector<8x128xf32>
    %126 = arith.negf %125 : vector<8x128xf32>
    %127 = math.exp %126 : vector<8x128xf32>
    %cst_44 = arith.constant 1.000000e+00 : f32
    %128 = vector.broadcast %cst_44 : f32 to vector<8x128xf32>
    %129 = arith.addf %128, %127 : vector<8x128xf32>
    %130 = arith.divf %128, %129 : vector<8x128xf32>
    %131 = vector.extract_strided_slice %124 {offsets = [0, 128], sizes = [8, 128], strides = [1, 1]} : vector<8x512xf32> to vector<8x128xf32>
    %132 = arith.negf %131 : vector<8x128xf32>
    %133 = math.exp %132 : vector<8x128xf32>
    %cst_45 = arith.constant 1.000000e+00 : f32
    %134 = vector.broadcast %cst_45 : f32 to vector<8x128xf32>
    %135 = arith.addf %134, %133 : vector<8x128xf32>
    %136 = arith.divf %134, %135 : vector<8x128xf32>
    %137 = vector.extract_strided_slice %124 {offsets = [0, 256], sizes = [8, 128], strides = [1, 1]} : vector<8x512xf32> to vector<8x128xf32>
    %138 = math.tanh %137 : vector<8x128xf32>
    %139 = vector.extract_strided_slice %124 {offsets = [0, 384], sizes = [8, 128], strides = [1, 1]} : vector<8x512xf32> to vector<8x128xf32>
    %140 = arith.negf %139 : vector<8x128xf32>
    %141 = math.exp %140 : vector<8x128xf32>
    %cst_46 = arith.constant 1.000000e+00 : f32
    %142 = vector.broadcast %cst_46 : f32 to vector<8x128xf32>
    %143 = arith.addf %142, %141 : vector<8x128xf32>
    %144 = arith.divf %142, %143 : vector<8x128xf32>
    %145 = arith.mulf %136, %112 : vector<8x128xf32>
    %146 = arith.mulf %130, %138 : vector<8x128xf32>
    %147 = arith.addf %145, %146 : vector<8x128xf32>
    %148 = math.tanh %147 : vector<8x128xf32>
    %149 = arith.mulf %144, %148 : vector<8x128xf32>
    %150 = math.tanh %149 : vector<8x128xf32>
    %151 = arith.index_cast %c3_i32 : i32 to index
    %c0_47 = arith.constant 0 : index
    %c0_48 = arith.constant 0 : index
    %152 = vector.load %arg6[%151, %c0_47, %c0_48] : memref<8x8x128xf32, #tpu.memory_space<vmem>>, vector<1x8x128xf32>
    %153 = vector.shape_cast %152 : vector<1x8x128xf32> to vector<8x128xf32>
    %154 = vector.shape_cast %150 : vector<8x128xf32> to vector<1x8x128xf32>
    tpu.vector_store %arg6[%151, %c0_47, %c0_48], %154 {strides = array<i32>} : memref<8x8x128xf32, #tpu.memory_space<vmem>>, vector<1x8x128xf32>,
    %c4_i32 = arith.constant 4 : i32
    %155 = arith.index_cast %c4_i32 : i32 to index
    %c0_49 = arith.constant 0 : index
    %c0_50 = arith.constant 0 : index
    %156 = vector.load %arg9[%155, %c0_49, %c0_50] : memref<8x8x512xf32, #tpu.memory_space<vmem>>, vector<1x8x512xf32>
    %157 = vector.shape_cast %156 : vector<1x8x512xf32> to vector<8x512xf32>
    %cst_51 = arith.constant dense<0.000000e+00> : vector<8x512xf32>
    %158 = tpu.matmul %149, %4, %cst_51 {dimension_numbers = #tpu.dot_dimension_numbers<[1], [0], [0], [1], [0, 0, 1, 1], [], []>} : vector<8x128xf32>, vector<128x512xf32>, vector<8x512xf32> -> vector<8x512xf32>
    %159 = arith.addf %157, %158 : vector<8x512xf32>
    %160 = vector.extract_strided_slice %159 {offsets = [0, 0], sizes = [8, 128], strides = [1, 1]} : vector<8x512xf32> to vector<8x128xf32>
    %161 = arith.negf %160 : vector<8x128xf32>
    %162 = math.exp %161 : vector<8x128xf32>
    %cst_52 = arith.constant 1.000000e+00 : f32
    %163 = vector.broadcast %cst_52 : f32 to vector<8x128xf32>
    %164 = arith.addf %163, %162 : vector<8x128xf32>
    %165 = arith.divf %163, %164 : vector<8x128xf32>
    %166 = vector.extract_strided_slice %159 {offsets = [0, 128], sizes = [8, 128], strides = [1, 1]} : vector<8x512xf32> to vector<8x128xf32>
    %167 = arith.negf %166 : vector<8x128xf32>
    %168 = math.exp %167 : vector<8x128xf32>
    %cst_53 = arith.constant 1.000000e+00 : f32
    %169 = vector.broadcast %cst_53 : f32 to vector<8x128xf32>
    %170 = arith.addf %169, %168 : vector<8x128xf32>
    %171 = arith.divf %169, %170 : vector<8x128xf32>
    %172 = vector.extract_strided_slice %159 {offsets = [0, 256], sizes = [8, 128], strides = [1, 1]} : vector<8x512xf32> to vector<8x128xf32>
    %173 = math.tanh %172 : vector<8x128xf32>
    %174 = vector.extract_strided_slice %159 {offsets = [0, 384], sizes = [8, 128], strides = [1, 1]} : vector<8x512xf32> to vector<8x128xf32>
    %175 = arith.negf %174 : vector<8x128xf32>
    %176 = math.exp %175 : vector<8x128xf32>
    %cst_54 = arith.constant 1.000000e+00 : f32
    %177 = vector.broadcast %cst_54 : f32 to vector<8x128xf32>
    %178 = arith.addf %177, %176 : vector<8x128xf32>
    %179 = arith.divf %177, %178 : vector<8x128xf32>
    %180 = arith.mulf %171, %147 : vector<8x128xf32>
    %181 = arith.mulf %165, %173 : vector<8x128xf32>
    %182 = arith.addf %180, %181 : vector<8x128xf32>
    %183 = math.tanh %182 : vector<8x128xf32>
    %184 = arith.mulf %179, %183 : vector<8x128xf32>
    %185 = math.tanh %184 : vector<8x128xf32>
    %186 = arith.index_cast %c4_i32 : i32 to index
    %c0_55 = arith.constant 0 : index
    %c0_56 = arith.constant 0 : index
    %187 = vector.load %arg6[%186, %c0_55, %c0_56] : memref<8x8x128xf32, #tpu.memory_space<vmem>>, vector<1x8x128xf32>
    %188 = vector.shape_cast %187 : vector<1x8x128xf32> to vector<8x128xf32>
    %189 = vector.shape_cast %185 : vector<8x128xf32> to vector<1x8x128xf32>
    tpu.vector_store %arg6[%186, %c0_55, %c0_56], %189 {strides = array<i32>} : memref<8x8x128xf32, #tpu.memory_space<vmem>>, vector<1x8x128xf32>,
    %c5_i32 = arith.constant 5 : i32
    %190 = arith.index_cast %c5_i32 : i32 to index
    %c0_57 = arith.constant 0 : index
    %c0_58 = arith.constant 0 : index
    %191 = vector.load %arg9[%190, %c0_57, %c0_58] : memref<8x8x512xf32, #tpu.memory_space<vmem>>, vector<1x8x512xf32>
    %192 = vector.shape_cast %191 : vector<1x8x512xf32> to vector<8x512xf32>
    %cst_59 = arith.constant dense<0.000000e+00> : vector<8x512xf32>
    %193 = tpu.matmul %184, %4, %cst_59 {dimension_numbers = #tpu.dot_dimension_numbers<[1], [0], [0], [1], [0, 0, 1, 1], [], []>} : vector<8x128xf32>, vector<128x512xf32>, vector<8x512xf32> -> vector<8x512xf32>
    %194 = arith.addf %192, %193 : vector<8x512xf32>
    %195 = vector.extract_strided_slice %194 {offsets = [0, 0], sizes = [8, 128], strides = [1, 1]} : vector<8x512xf32> to vector<8x128xf32>
    %196 = arith.negf %195 : vector<8x128xf32>
    %197 = math.exp %196 : vector<8x128xf32>
    %cst_60 = arith.constant 1.000000e+00 : f32
    %198 = vector.broadcast %cst_60 : f32 to vector<8x128xf32>
    %199 = arith.addf %198, %197 : vector<8x128xf32>
    %200 = arith.divf %198, %199 : vector<8x128xf32>
    %201 = vector.extract_strided_slice %194 {offsets = [0, 128], sizes = [8, 128], strides = [1, 1]} : vector<8x512xf32> to vector<8x128xf32>
    %202 = arith.negf %201 : vector<8x128xf32>
    %203 = math.exp %202 : vector<8x128xf32>
    %cst_61 = arith.constant 1.000000e+00 : f32
    %204 = vector.broadcast %cst_61 : f32 to vector<8x128xf32>
    %205 = arith.addf %204, %203 : vector<8x128xf32>
    %206 = arith.divf %204, %205 : vector<8x128xf32>
    %207 = vector.extract_strided_slice %194 {offsets = [0, 256], sizes = [8, 128], strides = [1, 1]} : vector<8x512xf32> to vector<8x128xf32>
    %208 = math.tanh %207 : vector<8x128xf32>
    %209 = vector.extract_strided_slice %194 {offsets = [0, 384], sizes = [8, 128], strides = [1, 1]} : vector<8x512xf32> to vector<8x128xf32>
    %210 = arith.negf %209 : vector<8x128xf32>
    %211 = math.exp %210 : vector<8x128xf32>
    %cst_62 = arith.constant 1.000000e+00 : f32
    %212 = vector.broadcast %cst_62 : f32 to vector<8x128xf32>
    %213 = arith.addf %212, %211 : vector<8x128xf32>
    %214 = arith.divf %212, %213 : vector<8x128xf32>
    %215 = arith.mulf %206, %182 : vector<8x128xf32>
    %216 = arith.mulf %200, %208 : vector<8x128xf32>
    %217 = arith.addf %215, %216 : vector<8x128xf32>
    %218 = math.tanh %217 : vector<8x128xf32>
    %219 = arith.mulf %214, %218 : vector<8x128xf32>
    %220 = math.tanh %219 : vector<8x128xf32>
    %221 = arith.index_cast %c5_i32 : i32 to index
    %c0_63 = arith.constant 0 : index
    %c0_64 = arith.constant 0 : index
    %222 = vector.load %arg6[%221, %c0_63, %c0_64] : memref<8x8x128xf32, #tpu.memory_space<vmem>>, vector<1x8x128xf32>
    %223 = vector.shape_cast %222 : vector<1x8x128xf32> to vector<8x128xf32>
    %224 = vector.shape_cast %220 : vector<8x128xf32> to vector<1x8x128xf32>
    tpu.vector_store %arg6[%221, %c0_63, %c0_64], %224 {strides = array<i32>} : memref<8x8x128xf32, #tpu.memory_space<vmem>>, vector<1x8x128xf32>,
    %c6_i32 = arith.constant 6 : i32
    %225 = arith.index_cast %c6_i32 : i32 to index
    %c0_65 = arith.constant 0 : index
    %c0_66 = arith.constant 0 : index
    %226 = vector.load %arg9[%225, %c0_65, %c0_66] : memref<8x8x512xf32, #tpu.memory_space<vmem>>, vector<1x8x512xf32>
    %227 = vector.shape_cast %226 : vector<1x8x512xf32> to vector<8x512xf32>
    %cst_67 = arith.constant dense<0.000000e+00> : vector<8x512xf32>
    %228 = tpu.matmul %219, %4, %cst_67 {dimension_numbers = #tpu.dot_dimension_numbers<[1], [0], [0], [1], [0, 0, 1, 1], [], []>} : vector<8x128xf32>, vector<128x512xf32>, vector<8x512xf32> -> vector<8x512xf32>
    %229 = arith.addf %227, %228 : vector<8x512xf32>
    %230 = vector.extract_strided_slice %229 {offsets = [0, 0], sizes = [8, 128], strides = [1, 1]} : vector<8x512xf32> to vector<8x128xf32>
    %231 = arith.negf %230 : vector<8x128xf32>
    %232 = math.exp %231 : vector<8x128xf32>
    %cst_68 = arith.constant 1.000000e+00 : f32
    %233 = vector.broadcast %cst_68 : f32 to vector<8x128xf32>
    %234 = arith.addf %233, %232 : vector<8x128xf32>
    %235 = arith.divf %233, %234 : vector<8x128xf32>
    %236 = vector.extract_strided_slice %229 {offsets = [0, 128], sizes = [8, 128], strides = [1, 1]} : vector<8x512xf32> to vector<8x128xf32>
    %237 = arith.negf %236 : vector<8x128xf32>
    %238 = math.exp %237 : vector<8x128xf32>
    %cst_69 = arith.constant 1.000000e+00 : f32
    %239 = vector.broadcast %cst_69 : f32 to vector<8x128xf32>
    %240 = arith.addf %239, %238 : vector<8x128xf32>
    %241 = arith.divf %239, %240 : vector<8x128xf32>
    %242 = vector.extract_strided_slice %229 {offsets = [0, 256], sizes = [8, 128], strides = [1, 1]} : vector<8x512xf32> to vector<8x128xf32>
    %243 = math.tanh %242 : vector<8x128xf32>
    %244 = vector.extract_strided_slice %229 {offsets = [0, 384], sizes = [8, 128], strides = [1, 1]} : vector<8x512xf32> to vector<8x128xf32>
    %245 = arith.negf %244 : vector<8x128xf32>
    %246 = math.exp %245 : vector<8x128xf32>
    %cst_70 = arith.constant 1.000000e+00 : f32
    %247 = vector.broadcast %cst_70 : f32 to vector<8x128xf32>
    %248 = arith.addf %247, %246 : vector<8x128xf32>
    %249 = arith.divf %247, %248 : vector<8x128xf32>
    %250 = arith.mulf %241, %217 : vector<8x128xf32>
    %251 = arith.mulf %235, %243 : vector<8x128xf32>
    %252 = arith.addf %250, %251 : vector<8x128xf32>
    %253 = math.tanh %252 : vector<8x128xf32>
    %254 = arith.mulf %249, %253 : vector<8x128xf32>
    %255 = math.tanh %254 : vector<8x128xf32>
    %256 = arith.index_cast %c6_i32 : i32 to index
    %c0_71 = arith.constant 0 : index
    %c0_72 = arith.constant 0 : index
    %257 = vector.load %arg6[%256, %c0_71, %c0_72] : memref<8x8x128xf32, #tpu.memory_space<vmem>>, vector<1x8x128xf32>
    %258 = vector.shape_cast %257 : vector<1x8x128xf32> to vector<8x128xf32>
    %259 = vector.shape_cast %255 : vector<8x128xf32> to vector<1x8x128xf32>
    tpu.vector_store %arg6[%256, %c0_71, %c0_72], %259 {strides = array<i32>} : memref<8x8x128xf32, #tpu.memory_space<vmem>>, vector<1x8x128xf32>,
    %c7_i32 = arith.constant 7 : i32
    %260 = arith.index_cast %c7_i32 : i32 to index
    %c0_73 = arith.constant 0 : index
    %c0_74 = arith.constant 0 : index
    %261 = vector.load %arg9[%260, %c0_73, %c0_74] : memref<8x8x512xf32, #tpu.memory_space<vmem>>, vector<1x8x512xf32>
    %262 = vector.shape_cast %261 : vector<1x8x512xf32> to vector<8x512xf32>
    %cst_75 = arith.constant dense<0.000000e+00> : vector<8x512xf32>
    %263 = tpu.matmul %254, %4, %cst_75 {dimension_numbers = #tpu.dot_dimension_numbers<[1], [0], [0], [1], [0, 0, 1, 1], [], []>} : vector<8x128xf32>, vector<128x512xf32>, vector<8x512xf32> -> vector<8x512xf32>
    %264 = arith.addf %262, %263 : vector<8x512xf32>
    %265 = vector.extract_strided_slice %264 {offsets = [0, 0], sizes = [8, 128], strides = [1, 1]} : vector<8x512xf32> to vector<8x128xf32>
    %266 = arith.negf %265 : vector<8x128xf32>
    %267 = math.exp %266 : vector<8x128xf32>
    %cst_76 = arith.constant 1.000000e+00 : f32
    %268 = vector.broadcast %cst_76 : f32 to vector<8x128xf32>
    %269 = arith.addf %268, %267 : vector<8x128xf32>
    %270 = arith.divf %268, %269 : vector<8x128xf32>
    %271 = vector.extract_strided_slice %264 {offsets = [0, 128], sizes = [8, 128], strides = [1, 1]} : vector<8x512xf32> to vector<8x128xf32>
    %272 = arith.negf %271 : vector<8x128xf32>
    %273 = math.exp %272 : vector<8x128xf32>
    %cst_77 = arith.constant 1.000000e+00 : f32
    %274 = vector.broadcast %cst_77 : f32 to vector<8x128xf32>
    %275 = arith.addf %274, %273 : vector<8x128xf32>
    %276 = arith.divf %274, %275 : vector<8x128xf32>
    %277 = vector.extract_strided_slice %264 {offsets = [0, 256], sizes = [8, 128], strides = [1, 1]} : vector<8x512xf32> to vector<8x128xf32>
    %278 = math.tanh %277 : vector<8x128xf32>
    %279 = vector.extract_strided_slice %264 {offsets = [0, 384], sizes = [8, 128], strides = [1, 1]} : vector<8x512xf32> to vector<8x128xf32>
    %280 = arith.negf %279 : vector<8x128xf32>
    %281 = math.exp %280 : vector<8x128xf32>
    %cst_78 = arith.constant 1.000000e+00 : f32
    %282 = vector.broadcast %cst_78 : f32 to vector<8x128xf32>
    %283 = arith.addf %282, %281 : vector<8x128xf32>
    %284 = arith.divf %282, %283 : vector<8x128xf32>
    %285 = arith.mulf %276, %252 : vector<8x128xf32>
    %286 = arith.mulf %270, %278 : vector<8x128xf32>
    %287 = arith.addf %285, %286 : vector<8x128xf32>
    %288 = math.tanh %287 : vector<8x128xf32>
    %289 = arith.mulf %284, %288 : vector<8x128xf32>
    %290 = math.tanh %289 : vector<8x128xf32>
    %291 = arith.index_cast %c7_i32 : i32 to index
    %c0_79 = arith.constant 0 : index
    %c0_80 = arith.constant 0 : index
    %292 = vector.load %arg6[%291, %c0_79, %c0_80] : memref<8x8x128xf32, #tpu.memory_space<vmem>>, vector<1x8x128xf32>
    %293 = vector.shape_cast %292 : vector<1x8x128xf32> to vector<8x128xf32>
    %294 = vector.shape_cast %290 : vector<8x128xf32> to vector<1x8x128xf32>
    tpu.vector_store %arg6[%291, %c0_79, %c0_80], %294 {strides = array<i32>} : memref<8x8x128xf32, #tpu.memory_space<vmem>>, vector<1x8x128xf32>,
    %c8_i32 = arith.constant 8 : i32
    %c0_81 = arith.constant 0 : index
    %c0_82 = arith.constant 0 : index
    %295 = vector.load %arg7[%c0_81, %c0_82] : memref<8x128xf32, #tpu.memory_space<vmem>>, vector<8x128xf32>
    tpu.vector_store %arg7[%c0_81, %c0_82], %289 {strides = array<i32>} : memref<8x128xf32, #tpu.memory_space<vmem>>, vector<8x128xf32>,
    %c0_83 = arith.constant 0 : index
    %c0_84 = arith.constant 0 : index
    %296 = vector.load %arg8[%c0_83, %c0_84] : memref<8x128xf32, #tpu.memory_space<vmem>>, vector<8x128xf32>
    tpu.vector_store %arg8[%c0_83, %c0_84], %287 {strides = array<i32>} : memref<8x128xf32, #tpu.memory_space<vmem>>, vector<8x128xf32>,
    return
  }
  func.func @transform_0(%arg0: i32, %arg1: i32) -> (i32, i32, i32) {
    %c0_i32 = arith.constant 0 : i32
    %c0_i32_0 = arith.constant 0 : i32
    return %arg1, %arg0, %c0_i32 : i32, i32, i32
  }
  func.func @transform_1(%arg0: i32, %arg1: i32) -> (i32, i32) {
    %c0_i32 = arith.constant 0 : i32
    %c0_i32_0 = arith.constant 0 : i32
    %c0_i32_1 = arith.constant 0 : i32
    return %c0_i32, %c0_i32_0 : i32, i32
  }
  func.func @transform_2(%arg0: i32, %arg1: i32) -> (i32, i32) {
    %c0_i32 = arith.constant 0 : i32
    %c0_i32_0 = arith.constant 0 : i32
    %c0_i32_1 = arith.constant 0 : i32
    return %c0_i32, %c0_i32_0 : i32, i32
  }
  func.func @transform_3(%arg0: i32, %arg1: i32) -> (i32, i32) {
    %c0_i32 = arith.constant 0 : i32
    %c0_i32_0 = arith.constant 0 : i32
    %c0_i32_1 = arith.constant 0 : i32
    return %c0_i32, %c0_i32_0 : i32, i32
  }
  func.func @transform_4(%arg0: i32, %arg1: i32) -> (i32, i32, i32) {
    %c0_i32 = arith.constant 0 : i32
    %c0_i32_0 = arith.constant 0 : i32
    return %arg1, %arg0, %c0_i32 : i32, i32, i32
  }
}

module attributes {stable_mosaic.version = 11 : i64} {
  func.func @_classifier_head_kernel(%arg0: i32, %arg1: memref<8x8x128xf32, #tpu.memory_space<vmem>>, %arg2: memref<128x128xf32, #tpu.memory_space<vmem>>, %arg3: memref<1x128xf32, #tpu.memory_space<vmem>>, %arg4: memref<8x8x128xf32, #tpu.memory_space<vmem>>, %arg5: memref<8x8xi32, #tpu.memory_space<vmem>>) attributes {dimension_semantics = [#tpu.dimension_semantics<parallel>], iteration_bounds = array<i64: 1>, scalar_prefetch = 0 : i64, scratch_operands = 0 : i64, tpu.core_type = #tpu.core_type<tc>, window_params = [{transform_indices = @transform_0, window_bounds = array<i64: 8, 8, 128>}, {pipeline_mode = #tpu.pipeline_mode<synchronous>, transform_indices = @transform_1, window_bounds = array<i64: 128, 128>}, {pipeline_mode = #tpu.pipeline_mode<synchronous>, transform_indices = @transform_2, window_bounds = array<i64: 1, 128>}, {transform_indices = @transform_3, window_bounds = array<i64: 8, 8, 128>}, {transform_indices = @transform_4, window_bounds = array<i64: 8, 8>}]} {
    %c0 = arith.constant 0 : index
    %c0_0 = arith.constant 0 : index
    %0 = vector.load %arg2[%c0, %c0_0] : memref<128x128xf32, #tpu.memory_space<vmem>>, vector<128x128xf32>
    %c0_1 = arith.constant 0 : index
    %c0_2 = arith.constant 0 : index
    %c0_3 = arith.constant 0 : index
    %1 = vector.load %arg1[%c0_1, %c0_2, %c0_3] : memref<8x8x128xf32, #tpu.memory_space<vmem>>, vector<8x8x128xf32>
    %2 = vector.shape_cast %1 : vector<8x8x128xf32> to vector<64x128xf32>
    %cst = arith.constant dense<0.000000e+00> : vector<64x128xf32>
    %3 = tpu.matmul %2, %0, %cst {dimension_numbers = #tpu.dot_dimension_numbers<[1], [0], [0], [1], [0, 0, 1, 1], [], []>} : vector<64x128xf32>, vector<128x128xf32>, vector<64x128xf32> -> vector<64x128xf32>
    %c0_4 = arith.constant 0 : index
    %c0_5 = arith.constant 0 : index
    %4 = vector.load %arg3[%c0_4, %c0_5] : memref<1x128xf32, #tpu.memory_space<vmem>>, vector<1x128xf32>
    %5 = vector.broadcast %4 : vector<1x128xf32> to vector<64x128xf32>
    %6 = arith.addf %3, %5 : vector<64x128xf32>
    %7 = vector.shape_cast %6 : vector<64x128xf32> to vector<8x8x128xf32>
    %cst_6 = arith.constant dense<0xFF800000> : vector<8x8xf32>
    %8 = vector.multi_reduction <maximumf>, %7, %cst_6 [2] : vector<8x8x128xf32> to vector<8x8xf32>
    %9 = vector.shape_cast %8 : vector<8x8xf32> to vector<8x8x1xf32>
    %10 = vector.broadcast %9 : vector<8x8x1xf32> to vector<8x8x128xf32>
    %11 = arith.subf %7, %10 : vector<8x8x128xf32>
    %12 = math.exp %11 : vector<8x8x128xf32>
    %cst_7 = arith.constant dense<0.000000e+00> : vector<8x8xf32>
    %13 = vector.multi_reduction <add>, %12, %cst_7 [2] : vector<8x8x128xf32> to vector<8x8xf32>
    %14 = vector.shape_cast %13 : vector<8x8xf32> to vector<8x8x1xf32>
    %15 = tpu.reciprocal %14 {approx = true} : vector<8x8x1xf32> -> vector<8x8x1xf32>
    %16 = vector.broadcast %15 : vector<8x8x1xf32> to vector<8x8x128xf32>
    %17 = arith.mulf %12, %16 : vector<8x8x128xf32>
    %c0_8 = arith.constant 0 : index
    %c0_9 = arith.constant 0 : index
    %c0_10 = arith.constant 0 : index
    %18 = vector.load %arg4[%c0_8, %c0_9, %c0_10] : memref<8x8x128xf32, #tpu.memory_space<vmem>>, vector<8x8x128xf32>
    tpu.vector_store %arg4[%c0_8, %c0_9, %c0_10], %17 {strides = array<i32>} : memref<8x8x128xf32, #tpu.memory_space<vmem>>, vector<8x8x128xf32>,
    %19 = tpu.iota {dimensions = array<i32: 2>} : vector<8x8x128xi32>
    %20 = vector.broadcast %9 : vector<8x8x1xf32> to vector<8x8x128xf32>
    %21 = arith.cmpf oge, %7, %20 : vector<8x8x128xf32>
    %c128_i32 = arith.constant 128 : i32
    %22 = vector.broadcast %c128_i32 : i32 to vector<8x8x128xi32>
    %23 = arith.select %21, %19, %22 : vector<8x8x128xi1>, vector<8x8x128xi32>
    %cst_11 = arith.constant dense<2147483647> : vector<8x8xi32>
    %24 = vector.multi_reduction <minsi>, %23, %cst_11 [2] : vector<8x8x128xi32> to vector<8x8xi32>
    %c0_12 = arith.constant 0 : index
    %c0_13 = arith.constant 0 : index
    %25 = vector.load %arg5[%c0_12, %c0_13] : memref<8x8xi32, #tpu.memory_space<vmem>>, vector<8x8xi32>
    tpu.vector_store %arg5[%c0_12, %c0_13], %24 {strides = array<i32>} : memref<8x8xi32, #tpu.memory_space<vmem>>, vector<8x8xi32>,
    return
  }
  func.func @transform_0(%arg0: i32) -> (i32, i32, i32) {
    %c0_i32 = arith.constant 0 : i32
    %c0_i32_0 = arith.constant 0 : i32
    %c0_i32_1 = arith.constant 0 : i32
    return %arg0, %c0_i32, %c0_i32_0 : i32, i32, i32
  }
  func.func @transform_1(%arg0: i32) -> (i32, i32) {
    %c0_i32 = arith.constant 0 : i32
    %c0_i32_0 = arith.constant 0 : i32
    %c0_i32_1 = arith.constant 0 : i32
    return %c0_i32, %c0_i32_0 : i32, i32
  }
  func.func @transform_2(%arg0: i32) -> (i32, i32) {
    %c0_i32 = arith.constant 0 : i32
    %c0_i32_0 = arith.constant 0 : i32
    %c0_i32_1 = arith.constant 0 : i32
    return %c0_i32, %c0_i32_0 : i32, i32
  }
  func.func @transform_3(%arg0: i32) -> (i32, i32, i32) {
    %c0_i32 = arith.constant 0 : i32
    %c0_i32_0 = arith.constant 0 : i32
    %c0_i32_1 = arith.constant 0 : i32
    return %arg0, %c0_i32, %c0_i32_0 : i32, i32, i32
  }
  func.func @transform_4(%arg0: i32) -> (i32, i32) {
    %c0_i32 = arith.constant 0 : i32
    %c0_i32_0 = arith.constant 0 : i32
    return %arg0, %c0_i32 : i32, i32
  }
}

</mosaic_0001>

<bundles_post_ra>
// kernel: _analyser_forward.3
= control target key start
LH: loop header
LB: loop body
LE: loop exit
PB: predicated region body
PF: predicated region fallthrough
CT: control target
= control target key end

     0   :  { %v232_v49 = vlaneseq  ;;  %s850_s1 = inlined_call_operand.vmem [shape: f32[128,128], index: 1, kind: input, shape index: {}]   ;;  %s851_s0 = inlined_call_operand.vmem [shape: f32[8,8,128], index: 0, kind: input, shape index: {}]   ;;  %s852_s2 = inlined_call_operand.vmem [shape: f32[1,128], index: 2, kind: input, shape index: {}]   ;;  %s853_s3 = inlined_call_operand.vmem [shape: f32[8,8,128], index: 3, kind: output, shape index: {0}]   ;;  %s854_s4 = inlined_call_operand.vmem [shape: s32[8,8], index: 4, kind: output, shape index: {1}]  }
   0x1   :  { %v16_v0 = vld [vmem:[%s850_s1] sm:$0xff]  ;;  %v17_v1 = vld [vmem:[%s850_s1 + $0x8] sm:$0xff]  ;;  %v18_v2 = vld [vmem:[%s850_s1 + $0x10] sm:$0xff] }
   0x2   :  { %v487_v3 = vpack.c.bf16 %v17_v1, %v16_v0  ;;  %v19_v4 = vld [vmem:[%s850_s1 + $0x18] sm:$0xff]  ;;  %v20_v6 = vld [vmem:[%s850_s1 + $0x20] sm:$0xff]  ;;  %v21_v7 = vld [vmem:[%s850_s1 + $0x28] sm:$0xff]  ;;  %v677_v50 = vand.u32 127, %v232_v49 }
   0x3   :  { %v491_v5 = vpack.c.bf16 %v19_v4, %v18_v2  ;;  %v495_v8 = vpack.c.bf16 %v21_v7, %v20_v6  ;;  %v32_v9 = vld [vmem:[%s851_s0] sm:$0xff]  ;;  %v22_v10 = vld [vmem:[%s850_s1 + $0x30] sm:$0xff]  ;;  %v23_v11 = vld [vmem:[%s850_s1 + $0x38] sm:$0xff] }
   0x4   :  { %488 = vmatprep.subr.bf16.mxu0 %v487_v3  ;;  %519 = vmatprep.subr.bf16.mxu1 %v487_v3  ;;  %v36_v12 = vld [vmem:[%s851_s0 + $0x20] sm:$0xff]  ;;  %v499_v13 = vpack.c.bf16 %v23_v11, %v22_v10  ;;  %v25_v15 = vld [vmem:[%s850_s1 + $0x48] sm:$0xff]  ;;  %v26_v17 = vld [vmem:[%s850_s1 + $0x50] sm:$0xff] }
   0x5   :  { %490 = vmatpush3.bf16.msra.mxu0 %v487_v3  ;;  %527 = vmatpush3.bf16.msra.mxu1 %v487_v3  ;;  %v24_v14 = vld [vmem:[%s850_s1 + $0x40] sm:$0xff]  ;;  %v27_v18 = vld [vmem:[%s850_s1 + $0x58] sm:$0xff]  ;;  %v29_v21 = vld [vmem:[%s850_s1 + $0x68] sm:$0xff] }
   0x6   :  { %492 = vmatprep.subr.bf16.mxu0 %v491_v5  ;;  %520 = vmatprep.subr.bf16.mxu1 %v491_v5  ;;  %v503_v16 = vpack.c.bf16 %v25_v15, %v24_v14  ;;  %v507_v19 = vpack.c.bf16 %v27_v18, %v26_v17  ;;  %v28_v20 = vld [vmem:[%s850_s1 + $0x60] sm:$0xff]  ;;  %v30_v23 = vld [vmem:[%s850_s1 + $0x70] sm:$0xff]  ;;  %v31_v24 = vld [vmem:[%s850_s1 + $0x78] sm:$0xff] }
   0x7   :  { %475 = vmatprep.mubr.f32.mxu0 %v32_v9  ;;  %481 = vmatprep.mubr.f32.mxu1 %v36_v12  ;;  %v511_v22 = vpack.c.bf16 %v29_v21, %v28_v20  ;;  %v515_v25 = vpack.c.bf16 %v31_v24, %v30_v23  ;;  %v33_v26 = vld [vmem:[%s851_s0 + $0x8] sm:$0xff]  ;;  %v34_v28 = vld [vmem:[%s851_s0 + $0x10] sm:$0xff]  ;;  %v35_v30 = vld [vmem:[%s851_s0 + $0x18] sm:$0xff] }
   0x8   :  { %v37_v27 = vld [vmem:[%s851_s0 + $0x28] sm:$0xff]  ;;  %v38_v29 = vld [vmem:[%s851_s0 + $0x30] sm:$0xff]  ;;  %v39_v31 = vld [vmem:[%s851_s0 + $0x38] sm:$0xff] }
   0x9   :  { %494 = vmatpush3.bf16.msra.mxu0 %v491_v5  ;;  %528 = vmatpush3.bf16.msra.mxu1 %v491_v5  ;;  %v418_v32 = vld [vmem:[%s852_s2] ss:$0 sm:$0xff] }
   0xa   :  { %496 = vmatprep.subr.bf16.mxu0 %v495_v8  ;;  %521 = vmatprep.subr.bf16.mxu1 %v495_v8 }
   0xd   :  { %498 = vmatpush3.bf16.msra.mxu0 %v495_v8  ;;  %529 = vmatpush3.bf16.msra.mxu1 %v495_v8 }
   0xe   :  { %500 = vmatprep.subr.bf16.mxu0 %v499_v13  ;;  %522 = vmatprep.subr.bf16.mxu1 %v499_v13 }
  0x11   :  { %502 = vmatpush3.bf16.msra.mxu0 %v499_v13  ;;  %530 = vmatpush3.bf16.msra.mxu1 %v499_v13 }
  0x12   :  { %504 = vmatprep.subr.bf16.mxu0 %v503_v16  ;;  %523 = vmatprep.subr.bf16.mxu1 %v503_v16 }
  0x15   :  { %506 = vmatpush3.bf16.msra.mxu0 %v503_v16  ;;  %531 = vmatpush3.bf16.msra.mxu1 %v503_v16 }
  0x16   :  { %508 = vmatprep.subr.bf16.mxu0 %v507_v19  ;;  %524 = vmatprep.subr.bf16.mxu1 %v507_v19 }
  0x19   :  { %510 = vmatpush3.bf16.msra.mxu0 %v507_v19  ;;  %532 = vmatpush3.bf16.msra.mxu1 %v507_v19 }
  0x1a   :  { %512 = vmatprep.subr.bf16.mxu0 %v511_v22  ;;  %525 = vmatprep.subr.bf16.mxu1 %v511_v22 }
  0x1d   :  { %514 = vmatpush3.bf16.msra.mxu0 %v511_v22  ;;  %533 = vmatpush3.bf16.msra.mxu1 %v511_v22 }
  0x1e   :  { %516 = vmatprep.subr.bf16.mxu0 %v515_v25  ;;  %526 = vmatprep.subr.bf16.mxu1 %v515_v25 }
  0x21   :  { %518 = vmatpush3.bf16.msra.mxu0 %v515_v25  ;;  %534 = vmatpush3.bf16.msra.mxu1 %v515_v25 }
  0x24   :  { %476 = vmatmul.mubr.f32.vlgmr.msra.gmra.mrb[0].mxu0 %v33_v26  ;;  %482 = vmatmul.mubr.f32.vlgmr.msra.gmra.mrb[0].mxu1 %v37_v27 }
  0x25   :  { %478 = vmatprep.mubr.f32.mxu0 %v34_v28  ;;  %484 = vmatprep.mubr.f32.mxu1 %v38_v29 }
  0x28   :  { %479 = vmatmul.mubr.f32.gmra.mrb[2].mxu0 %v35_v30  ;;  %485 = vmatmul.mubr.f32.gmra.mrb[2].mxu1 %v39_v31 }
  0xf7   :  { %v477_v33 = vpop.f32.mrb[0].mxu0  ;;  %v483_v34 = vpop.f32.mrb[0].mxu1 }
  0xf8   :  { %v119_v35 = vadd.f32 %v477_v33, %v418_v32  ;;  %v113_v36 = vpop.f32.mrb[1].mxu0  ;;  %v133_v37 = vpop.f32.mrb[1].mxu1  ;;  %v139_v47 = vadd.f32 %v483_v34, %v418_v32 }
  0xf9   :  { %v114_v40 = vadd.f32 %v418_v32, %v113_v36  ;;  %v134_v44 = vadd.f32 %v418_v32, %v133_v37 }
  0xfa   :  { %154 = vmax.xlane.f32.xlu0 %v119_v35 }
  0xfb   :  { %v480_v38 = vpop.f32.mrb[2].mxu0  ;;  %v486_v39 = vpop.f32.mrb[2].mxu1 }
  0xfc   :  { %v667_v41 = vadd.f32 %v480_v38, %v418_v32  ;;  %v123_v42 = vpop.f32.mrb[3].mxu0  ;;  %v143_v43 = vpop.f32.mrb[3].mxu1  ;;  %v672_v48 = vadd.f32 %v486_v39, %v418_v32 }
  0xfd   :  { %v124_v45 = vadd.f32 %v418_v32, %v123_v42  ;;  %v670_v46 = vadd.f32 %v418_v32, %v143_v43 }
  0xfe   :  { %158 = vmax.xlane.f32.xlu1 %v667_v41  ;;  %152 = vmax.xlane.f32.xlu0 %v114_v40 }
 0x102   :  { %156 = vmax.xlane.f32.xlu1 %v124_v45  ;;  %160 = vmax.xlane.f32.xlu0 %v134_v44 }
 0x106   :  { %162 = vmax.xlane.f32.xlu1 %v139_v47  ;;  %164 = vmax.xlane.f32.xlu0 %v670_v46 }
 0x10a   :  { %166 = vmax.xlane.f32.xlu1 %v672_v48 }
 0x187   :  { %v155_v51 = vpop.xlane.xlu0 %154 }
 0x188   :  { %vm235_vm0 = vcmp.ge.f32.partialorder %v119_v35, %v155_v51  ;;  %v169_v1 = vsub.f32 %v119_v35, %v155_v51 }
 0x189   :  { %v680_v52 = vsel %vm235_vm0, %v677_v50, 128  ;;  %vm394_vm0 = vcmask 1041409  }
 0x18a   :  { %v265_v53 = vshra.s32 %v680_v52, 16  ;;  %v178_v13 = vmul.f32 1.442695, %v169_v1  ;;  %v264_v43 = vand.u32 65535, %v680_v52 }
 0x18b   :  { %v159_v54 = vpop.xlane.xlu1 %158  ;;  %v153_v55 = vpop.xlane.xlu0 %152 }
 0x18c   :  { %vm234_vm1 = vcmp.ge.f32.partialorder %v114_v40, %v153_v55  ;;  %v683_v56 = vcvt.s32.f32 %v265_v53  ;;  %v168_v61 = vsub.f32 %v114_v40, %v153_v55  ;;  %vm237_vm3 = vcmp.ge.f32.partialorder %v667_v41, %v159_v54 }
 0x18d   :  { %v686_v57 = vsel %vm234_vm1, %v677_v50, 128  ;;  %v702_v5 = vsel %vm237_vm3, %v677_v50, 128  ;;  %v171_v23 = vsub.f32 %v667_v41, %v159_v54  ;;  %vm396_vm1 = vcmask 1042434  }
 0x18e   :  { %268 = vmin.xlane.f32.xlu1 %v683_v56  ;;  %v251_v60 = vshra.s32 %v686_v57, 16  ;;  %v176_v6 = vmul.f32 1.442695, %v168_v61  ;;  %v293_v17 = vshra.s32 %v702_v5, 16  ;;  %v292_v61 = vand.u32 65535, %v702_v5 }
 0x18f   :  { %v157_v58 = vpop.xlane.xlu1 %156  ;;  %v161_v59 = vpop.xlane.xlu0 %160  ;;  %v182_v30 = vmul.f32 1.442695, %v171_v23  ;;  %vm400_vm3 = vcmask 1044484  }
 0x190   :  { %vm236_vm2 = vcmp.ge.f32.partialorder %v124_v45, %v157_v58  ;;  %vm238_vm4 = vcmp.ge.f32.partialorder %v134_v44, %v161_v59  ;;  %v691_v62 = vcvt.s32.f32 %v251_v60  ;;  %v172_v7 = vsub.f32 %v134_v44, %v161_v59 }
 0x191   :  { %v694_v63 = vsel %vm236_vm2, %v677_v50, 128  ;;  %v697_v0 = vsel %vm238_vm4, %v677_v50, 128  ;;  %v170_v14 = vsub.f32 %v124_v45, %v157_v58  ;;  %535 = vpow2.f32 %v176_v6 }
 0x192   :  { %254 = vmin.xlane.f32.xlu0 %v691_v62  ;;  %v307_v4 = vshra.s32 %v697_v0, 16  ;;  %v279_v10 = vshra.s32 %v694_v63, 16  ;;  %v184_v18 = vmul.f32 1.442695, %v172_v7  ;;  %537 = vpow2.f32 %v178_v13 }
 0x193   :  { %v163_v2 = vpop.xlane.xlu1 %162  ;;  %v165_v3 = vpop.xlane.xlu0 %164  ;;  %v180_v24 = vmul.f32 1.442695, %v170_v14  ;;  %v730_v27 = vcvt.s32.f32 %v293_v17  ;;  %v266_v45 = vcvt.s32.f32 %v264_v43  ;;  %v306_v53 = vand.u32 65535, %v697_v0 }
 0x194   :  { %vm239_vm5 = vcmp.ge.f32.partialorder %v139_v47, %v163_v2  ;;  %vm240_vm6 = vcmp.ge.f32.partialorder %v670_v46, %v165_v3  ;;  %v708_v9 = vcvt.s32.f32 %v307_v4  ;;  %v173_v15 = vsub.f32 %v139_v47, %v163_v2 }
 0x195   :  { %v705_v8 = vsel %vm239_vm5, %v677_v50, 128  ;;  %v712_v11 = vsel %vm240_vm6, %v677_v50, 128  ;;  %v723_v21 = vcvt.s32.f32 %v279_v10  ;;  %539 = vpow2.f32 %v184_v18 }
 0x196   :  { %v321_v12 = vshra.s32 %v705_v8, 16  ;;  %310 = vmin.xlane.f32.xlu0 %v708_v9  ;;  %v335_v22 = vshra.s32 %v712_v11, 16  ;;  %v186_v25 = vmul.f32 1.442695, %v173_v15  ;;  %v174_v26 = vsub.f32 %v670_v46, %v165_v3 }
 0x197   :  { %v167_v16 = vpop.xlane.xlu1 %166  ;;  %v250_v46 = vand.u32 65535, %v686_v57  ;;  %v320_v52 = vand.u32 65535, %v705_v8  ;;  %v308_v57 = vcvt.s32.f32 %v306_v53  ;;  %v278_v58 = vand.u32 65535, %v694_v63 }
 0x198   :  { %vm241_vm7 = vcmp.ge.f32.partialorder %v672_v48, %v167_v16  ;;  %v718_v19 = vcvt.s32.f32 %v321_v12  ;;  %v733_v29 = vcvt.s32.f32 %v335_v22  ;;  %541 = vpow2.f32 %v186_v25 }
 0x199   :  { %v721_v20 = vsel %vm241_vm7, %v677_v50, 128  ;;  %v175_v31 = vsub.f32 %v672_v48, %v167_v16  ;;  %543 = vpow2.f32 %v180_v24  ;;  %v188_v32 = vmul.f32 1.442695, %v174_v26 }
 0x19a   :  { %324 = vmin.xlane.f32.xlu1 %v718_v19  ;;  %282 = vmin.xlane.f32.xlu0 %v723_v21  ;;  %v349_v28 = vshra.s32 %v721_v20, 16  ;;  %545 = vpow2.f32 %v182_v30  ;;  %v252_v51 = vcvt.s32.f32 %v250_v46  ;;  %v322_v60 = vcvt.s32.f32 %v320_v52 }
 0x19b   :  { %v740_v34 = vpop.eup %535  ;;  %v190_v35 = vmul.f32 1.442695, %v175_v31  ;;  %547 = vpow2.f32 %v188_v32  ;;  %v280_v0 = vcvt.s32.f32 %v278_v58  ;;  %v334_v1 = vand.u32 65535, %v712_v11 }
 0x19c   :  { %v738_v33 = vcvt.s32.f32 %v349_v28  ;;  %v744_v36 = vpop.eup %537  ;;  %v294_v4 = vcvt.s32.f32 %v292_v61  ;;  %v348_v5 = vand.u32 65535, %v721_v20  ;;  %vm398_vm2 = vcmask 1043459  }
 0x19d   :  { %549 = vpow2.f32 %v190_v35  ;;  %v336_v7 = vcvt.s32.f32 %v334_v1  ;;  %vm402_vm4 = vcmask 1045509   ;;  %vm404_vm5 = vcmask 1046534  }
 0x19e   :  { %296 = vmin.xlane.f32.xlu1 %v730_v27  ;;  %338 = vmin.xlane.f32.xlu0 %v733_v29  ;;  %v350_v11 = vcvt.s32.f32 %v348_v5  ;;  %vm406_vm6 = vcmask 1047559   ;;  %vm408_vm7 = vcmask 64512  }
 0x19f   :  { %v746_v37 = vpop.eup %539 }
 0x1a2   :  { %352 = vmin.xlane.f32.xlu1 %v738_v33  ;;  %192 = vadd.xlane.f32.xlu0 %v740_v34  ;;  %v750_v38 = vpop.eup %541 }
 0x1a3   :  { %v752_v39 = vpop.eup %543 }
 0x1a4   :  { %v756_v40 = vpop.eup %545 }
 0x1a5   :  { %v758_v41 = vpop.eup %547 }
 0x1a6   :  { %194 = vadd.xlane.f32.xlu1 %v744_v36  ;;  %200 = vadd.xlane.f32.xlu0 %v746_v37 }
 0x1a7   :  { %v762_v42 = vpop.eup %549 }
 0x1aa   :  { %202 = vadd.xlane.f32.xlu1 %v750_v38  ;;  %196 = vadd.xlane.f32.xlu0 %v752_v39 }
 0x1ae   :  { %198 = vadd.xlane.f32.xlu1 %v756_v40  ;;  %204 = vadd.xlane.f32.xlu0 %v758_v41 }
 0x1b2   :  { %206 = vadd.xlane.f32.xlu1 %v762_v42 }
 0x21b   :  { %v766_v44 = vpop.xlane.xlu1 %268 }
 0x21c   :  { %vm270_vm8 = vcmp.eq.f32.partialorder %v683_v56, %v766_v44 }
 0x21d   :  { %v271_v47 = vsel %vm270_vm8, %v266_v45, inf }
 0x21e   :  { %272 = vmin.xlane.f32.xlu1 %v271_v47 }
 0x21f   :  { %v771_v48 = vpop.xlane.xlu0 %254 }
 0x220   :  { %vm256_vm9 = vcmp.eq.f32.partialorder %v691_v62, %v771_v48 }
 0x221   :  { %v257_v54 = vsel %vm256_vm9, %v252_v51, inf }
 0x222   :  { %258 = vmin.xlane.f32.xlu0 %v257_v54 }
 0x223   :  { %v777_v55 = vpop.xlane.xlu0 %310 }
 0x224   :  { %vm312_vm10 = vcmp.eq.f32.partialorder %v708_v9, %v777_v55  ;;  %v317_v58 = vcvt.f32.s32 %v777_v55 }
 0x225   :  { %v313_v56 = vsel %vm312_vm10, %v308_v57, inf }
 0x226   :  { %314 = vmin.xlane.f32.xlu0 %v313_v56 }
 0x227   :  { %v782_v59 = vpop.xlane.xlu1 %324  ;;  %v785_v62 = vpop.xlane.xlu0 %282 }
 0x228   :  { %vm326_vm11 = vcmp.eq.f32.partialorder %v718_v19, %v782_v59  ;;  %vm284_vm12 = vcmp.eq.f32.partialorder %v723_v21, %v785_v62  ;;  %v289_v52 = vcvt.f32.s32 %v785_v62 }
 0x229   :  { %v327_v2 = vsel %vm326_vm11, %v322_v60, inf  ;;  %v285_v63 = vsel %vm284_vm12, %v280_v0, inf }
 0x22a   :  { %328 = vmin.xlane.f32.xlu1 %v327_v2  ;;  %286 = vmin.xlane.f32.xlu0 %v285_v63  ;;  %v290_v0 = vshll.u32 %v289_v52, 16 }
 0x22b   :  { %v792_v3 = vpop.xlane.xlu1 %296  ;;  %v795_v6 = vpop.xlane.xlu0 %338 }
 0x22c   :  { %vm298_vm13 = vcmp.eq.f32.partialorder %v730_v27, %v792_v3  ;;  %vm340_vm14 = vcmp.eq.f32.partialorder %v733_v29, %v795_v6  ;;  %v303_v60 = vcvt.f32.s32 %v792_v3 }
 0x22d   :  { %v299_v8 = vsel %vm298_vm13, %v294_v4, inf  ;;  %v341_v9 = vsel %vm340_vm14, %v336_v7, inf  ;;  %v318_v4 = vshll.u32 %v317_v58, 16 }
 0x22e   :  { %300 = vmin.xlane.f32.xlu1 %v299_v8  ;;  %342 = vmin.xlane.f32.xlu0 %v341_v9  ;;  %v304_v8 = vshll.u32 %v303_v60, 16 }
 0x22f   :  { %v801_v10 = vpop.xlane.xlu1 %352  ;;  %v193_v12 = vpop.xlane.xlu0 %192 }
 0x230   :  { %vm354_vm15 = vcmp.eq.f32.partialorder %v738_v33, %v801_v10  ;;  %551 = vrcp.f32 %v193_v12  ;;  %v359_v55 = vcvt.f32.s32 %v801_v10 }
 0x231   :  { %v355_v13 = vsel %vm354_vm15, %v350_v11, inf }
 0x232   :  { %356 = vmin.xlane.f32.xlu1 %v355_v13 }
 0x233   :  { %v195_v14 = vpop.xlane.xlu1 %194  ;;  %v201_v15 = vpop.xlane.xlu0 %200 }
 0x234   :  { %553 = vrcp.f32 %v195_v14 }
 0x235   :  { %555 = vrcp.f32 %v201_v15 }
 0x237   :  { %v203_v16 = vpop.xlane.xlu1 %202  ;;  %v197_v17 = vpop.xlane.xlu0 %196 }
 0x238   :  { %557 = vrcp.f32 %v203_v16 }
 0x239   :  { %559 = vrcp.f32 %v197_v17 }
 0x23a   :  { %v552_v18 = vpop.eup %551 }
 0x23b   :  { %v199_v19 = vpop.xlane.xlu1 %198  ;;  %v216_v20 = vmul.f32 %v552_v18, %v740_v34  ;;  %v205_v21 = vpop.xlane.xlu0 %204  ;;  %v360_v18 = vshll.u32 %v359_v55, 16 }
 0x23c   :  { %561 = vrcp.f32 %v199_v19 }
 0x23d   :  { %563 = vrcp.f32 %v205_v21  ;;  %224 = vst [vmem:[%s853_s3] sm:$0xff] %v216_v20 }
 0x23e   :  { %v554_v22 = vpop.eup %553 }
 0x23f   :  { %v556_v23 = vpop.eup %555  ;;  %v217_v24 = vmul.f32 %v554_v22, %v744_v36  ;;  %v207_v25 = vpop.xlane.xlu1 %206 }
 0x240   :  { %v220_v26 = vmul.f32 %v556_v23, %v746_v37  ;;  %565 = vrcp.f32 %v207_v25  ;;  %v275_v37 = vcvt.f32.s32 %v766_v44 }
 0x241   :  { %225 = vst [vmem:[%s853_s3 + $0x8] sm:$0xff] %v217_v24 }
 0x242   :  { %v558_v27 = vpop.eup %557  ;;  %228 = vst [vmem:[%s853_s3 + $0x20] sm:$0xff] %v220_v26  ;;  %v276_v43 = vshll.u32 %v275_v37, 16 }
 0x243   :  { %v560_v28 = vpop.eup %559  ;;  %v221_v29 = vmul.f32 %v558_v27, %v750_v38 }
 0x244   :  { %v218_v30 = vmul.f32 %v560_v28, %v752_v39  ;;  %v261_v39 = vcvt.f32.s32 %v771_v48  ;;  %v331_v48 = vcvt.f32.s32 %v782_v59 }
 0x245   :  { %229 = vst [vmem:[%s853_s3 + $0x28] sm:$0xff] %v221_v29 }
 0x246   :  { %v562_v31 = vpop.eup %561  ;;  %226 = vst [vmem:[%s853_s3 + $0x10] sm:$0xff] %v218_v30  ;;  %v262_v46 = vshll.u32 %v261_v39, 16  ;;  %v332_v5 = vshll.u32 %v331_v48, 16 }
 0x247   :  { %v564_v32 = vpop.eup %563  ;;  %v219_v33 = vmul.f32 %v562_v31, %v756_v40  ;;  %v363_v40 = vshrl.u32 %v232_v49, 7 }
 0x248   :  { %v222_v34 = vmul.f32 %v564_v32, %v758_v41 }
 0x249   :  { %227 = vst [vmem:[%s853_s3 + $0x18] sm:$0xff] %v219_v33  ;;  %v364_v47 = vsub.s32 %v677_v50, %v363_v40  ;;  %v345_v50 = vcvt.f32.s32 %v795_v6 }
 0x24a   :  { %v566_v35 = vpop.eup %565  ;;  %230 = vst [vmem:[%s853_s3 + $0x30] sm:$0xff] %v222_v34 }
 0x24b   :  { %v223_v36 = vmul.f32 %v566_v35, %v762_v42  ;;  %v346_v11 = vshll.u32 %v345_v50, 16 }
 0x24d   :  { %231 = vst [vmem:[%s853_s3 + $0x38] sm:$0xff] %v223_v36 }
 0x2ab   :  { %v273_v38 = vpop.xlane.xlu1 %272 }
 0x2ac   :  { %v274_v41 = vcvt.f32.s32 %v273_v38 }
 0x2ae   :  { %v277_v51 = vadd.s32 %v276_v43, %v274_v41 }
 0x2af   :  { %v259_v45 = vpop.xlane.xlu0 %258 }
 0x2b0   :  { %v260_v53 = vcvt.f32.s32 %v259_v45  ;;  %v369_v57 = vrot.slane %v277_v51, %v364_v47 }
 0x2b2   :  { %v263_v42 = vadd.s32 %v262_v46, %v260_v53 }
 0x2b3   :  { %v315_v54 = vpop.xlane.xlu0 %314 }
 0x2b4   :  { %v365_v44 = vrot.slane %v263_v42, %v364_v47  ;;  %v316_v1 = vcvt.f32.s32 %v315_v54 }
 0x2b6   :  { %v395_v49 = vsel %vm394_vm0, %v369_v57, %v365_v44  ;;  %v319_v12 = vadd.s32 %v318_v4, %v316_v1 }
 0x2b7   :  { %v329_v56 = vpop.xlane.xlu1 %328  ;;  %v287_v61 = vpop.xlane.xlu0 %286 }
 0x2b8   :  { %v288_v2 = vcvt.f32.s32 %v287_v61  ;;  %v330_v63 = vcvt.f32.s32 %v329_v56  ;;  %v381_v21 = vrot.slane %v319_v12, %v364_v47 }
 0x2ba   :  { %v291_v62 = vadd.s32 %v290_v0, %v288_v2  ;;  %v333_v14 = vadd.s32 %v332_v5, %v330_v63 }
 0x2bb   :  { %v301_v7 = vpop.xlane.xlu1 %300  ;;  %v343_v9 = vpop.xlane.xlu0 %342 }
 0x2bc   :  { %v302_v59 = vcvt.f32.s32 %v301_v7  ;;  %v373_v3 = vrot.slane %v291_v62, %v364_v47  ;;  %v344_v13 = vcvt.f32.s32 %v343_v9  ;;  %v385_v10 = vrot.slane %v333_v14, %v364_v47 }
 0x2be   :  { %v305_v15 = vadd.s32 %v304_v8, %v302_v59  ;;  %v397_v6 = vsel %vm396_vm1, %v373_v3, %v395_v49  ;;  %v347_v16 = vadd.s32 %v346_v11, %v344_v13 }
 0x2bf   :  { %v357_v17 = vpop.xlane.xlu1 %356 }
 0x2c0   :  { %v377_v19 = vrot.slane %v305_v15, %v364_v47  ;;  %v358_v20 = vcvt.f32.s32 %v357_v17  ;;  %v389_v25 = vrot.slane %v347_v16, %v364_v47 }
 0x2c2   :  { %v399_v22 = vsel %vm398_vm2, %v377_v19, %v397_v6  ;;  %v361_v23 = vadd.s32 %v360_v18, %v358_v20 }
 0x2c3   :  { %v401_v24 = vsel %vm400_vm3, %v381_v21, %v399_v22 }
 0x2c4   :  { %v403_v26 = vsel %vm402_vm4, %v385_v10, %v401_v24  ;;  %v393_v27 = vrot.slane %v361_v23, %v364_v47 }
 0x2c5   :  { %v405_v28 = vsel %vm404_vm5, %v389_v25, %v403_v26 }
 0x2c6   :  { %v407_v29 = vsel %vm406_vm6, %v393_v27, %v405_v28 }
 0x2c7   :  { %409 = vst.msk [vmem:[%s854_s4] sm:$0xff] %vm408_vm7, %v407_v29 }

// kernel: _analyser_forward.2
= control target key start
LH: loop header
LB: loop body
LE: loop exit
PB: predicated region body
PF: predicated region fallthrough
CT: control target
= control target key end

     0   :  { %9 = vsyncpa [#allocation6], 0  ;;  %s3290_s0 = inlined_call_operand.vmem [shape: f32[8,8,128], index: 0, kind: input, shape index: {}]   ;;  %s3291_s1 = inlined_call_operand.hbm [shape: f32[128,512], index: 1, kind: input, shape index: {}]   ;;  %s3292_s2 = inlined_call_operand.hbm [shape: f32[128,512], index: 2, kind: input, shape index: {}]   ;;  %s3293_s3 = inlined_call_operand.vmem [shape: f32[1,512], index: 3, kind: input, shape index: {}]   ;;  %s3294_s4 = inlined_call_operand.vmem [shape: f32[8,8,128], index: 4, kind: output, shape index: {}]  }
   0x1   :  { %10 = vsyncpa [#allocation8], 0  ;;  %s2767_s15 = smov [#allocation5]   ;;  %s2719_s19 = scalar_lea.hbm %s3291_s1, 8192 }
   0x2   :  { %s18_s16 = sshll.u32 %s2767_s15, 4  ;;  %p2720_p0 = scmp.ne.s32.totalorder %s3291_s1, %s2719_s19  ;;  %s19_s16 = int_to_ptr.vmem [resolvable:$true] %s18_s16 }
   0x3   :  { %p2723_p1 = scmp.lt.u32.totalorder %s2719_s19, %s3291_s1 }
   0x5   :  { %p2725_p2 = pnand %p2723_p1, %p2720_p0 }
   0x7   :  { %2728 = shalt.err (!%p2725_p2)
}
   0x8   :  { %s2729_s24 = scalar_lea.vmem %s19_s16, 8192  ;;  %p2734_p4 = scmp.lt.s32.totalorder %s19_s16, %s19_s16 }
   0x9   :  { %p2730_p3 = scmp.ne.s32.totalorder %s19_s16, %s2729_s24  ;;  %p2735_p5 = scmp.lt.s32.totalorder %s2729_s24, %s2729_s24 }
   0xb   :  { %p2736_p6 = por %p2735_p5, %p2734_p4 }
   0xd   :  { %p2737_p7 = pnand %p2736_p6, %p2730_p3 }
   0xf   :  { %2740 = shalt.err (!%p2737_p7)
}
  0x10   :  { %s2768_s25 = smov 512   ;;  %s2769_s26 = smov 32  }
  0x11   :  { %24 = dma.hbm_to_vmem [thread:$0]  %s3291_s1, 8192, %s19_s16, [#allocation6], %s2768_s25, %s2768_s25, %s2769_s26  }
  0x12   :  { %s2770_s29 = smov [#allocation7]   ;;  %s2741_s7 = scalar_lea.hbm %s3292_s2, 8192 }
  0x13   :  { %s30_s30 = sshll.u32 %s2770_s29, 4  ;;  %p2742_p8 = scmp.ne.s32.totalorder %s3292_s2, %s2741_s7  ;;  %s31_s30 = int_to_ptr.vmem [resolvable:$true] %s30_s30 }
  0x14   :  { %p2745_p9 = scmp.lt.u32.totalorder %s2741_s7, %s3292_s2 }
  0x16   :  { %p2747_p10 = pnand %p2745_p9, %p2742_p8 }
  0x18   :  { %2750 = shalt.err (!%p2747_p10)
}
  0x19   :  { %s2751_s12 = scalar_lea.vmem %s31_s30, 8192  ;;  %p2756_p12 = scmp.lt.s32.totalorder %s31_s30, %s31_s30 }
  0x1a   :  { %p2752_p11 = scmp.ne.s32.totalorder %s31_s30, %s2751_s12  ;;  %p2757_p13 = scmp.lt.s32.totalorder %s2751_s12, %s2751_s12 }
  0x1c   :  { %p2758_p0 = por %p2757_p13, %p2756_p12 }
  0x1e   :  { %p2759_p1 = pnand %p2758_p0, %p2752_p11 }
  0x20   :  { %2762 = shalt.err (!%p2759_p1)
}
  0x21   :  { %36 = dma.hbm_to_vmem [thread:$0]  %s3292_s2, 8192, %s31_s30, [#allocation8], %s2768_s25, %s2768_s25, %s2769_s26  }
  0x22   :  { %2763 = dma.done.wait [#allocation6], 8192  }
  0x23   :  { %2764 = vsyncadd [#allocation6], 4294959104 }
  0x24   :  { %2765 = dma.done.wait [#allocation8], 8192  }
  0x25   :  { %2766 = vsyncadd [#allocation8], 4294959104  ;;  %v2771_v0 = vmov 0.0   ;;  %v52_v1 = vld [vmem:[#allocation5 + $0x8] sm:$0xff]  ;;  %v54_v3 = vld [vmem:[#allocation5 + $0x18] sm:$0xff] }
  0x26   :  { %273 = vmatprep.mubr.f32.mxu0 %v2771_v0  ;;  %386 = vmatprep.mubr.f32.mxu1 %v2771_v0  ;;  %v56_v2 = vld [vmem:[#allocation5 + $0x28] sm:$0xff]  ;;  %v58_v5 = vld [vmem:[#allocation5 + $0x38] sm:$0xff]  ;;  %v51_v6 = vld [vmem:[#allocation5] sm:$0xff] }
  0x27   :  { %v1930_v4 = vpack.c.bf16 %v56_v2, %v52_v1  ;;  %v55_v7 = vld [vmem:[#allocation5 + $0x20] sm:$0xff]  ;;  %v1962_v8 = vpack.c.bf16 %v58_v5, %v54_v3  ;;  %v53_v10 = vld [vmem:[#allocation5 + $0x10] sm:$0xff]  ;;  %v60_v12 = vld [vmem:[#allocation5 + $0x48] sm:$0xff] }
  0x28   :  { %v1932_v9 = vpack.c.bf16 %v55_v7, %v51_v6  ;;  %v57_v11 = vld [vmem:[#allocation5 + $0x30] sm:$0xff]  ;;  %v64_v14 = vld [vmem:[#allocation5 + $0x68] sm:$0xff]  ;;  %v62_v15 = vld [vmem:[#allocation5 + $0x58] sm:$0xff] }
  0x29   :  { %1931 = vmatprep.subr.bf16.mxu0 %v1930_v4  ;;  %v1964_v13 = vpack.c.bf16 %v57_v11, %v53_v10  ;;  %v66_v16 = vld [vmem:[#allocation5 + $0x78] sm:$0xff]  ;;  %1963 = vmatprep.subr.bf16.mxu1 %v1962_v8  ;;  %v1934_v17 = vpack.c.bf16 %v64_v14, %v60_v12  ;;  %v59_v19 = vld [vmem:[#allocation5 + $0x40] sm:$0xff]  ;;  %v61_v21 = vld [vmem:[#allocation5 + $0x50] sm:$0xff] }
  0x2a   :  { %1933 = vmatpush1.bf16.msra.mxu0 %v1932_v9  ;;  %v1966_v18 = vpack.c.bf16 %v66_v16, %v62_v15  ;;  %v63_v20 = vld [vmem:[#allocation5 + $0x60] sm:$0xff]  ;;  %v65_v23 = vld [vmem:[#allocation5 + $0x70] sm:$0xff]  ;;  %v68_v24 = vld [vmem:[#allocation5 + $0x88] sm:$0xff] }
  0x2b   :  { %1965 = vmatpush1.bf16.msra.mxu1 %v1964_v13  ;;  %v1936_v22 = vpack.c.bf16 %v63_v20, %v59_v19  ;;  %v72_v25 = vld [vmem:[#allocation5 + $0xa8] sm:$0xff]  ;;  %1935 = vmatprep.subr.bf16.mxu0 %v1934_v17  ;;  %v1968_v26 = vpack.c.bf16 %v65_v23, %v61_v21  ;;  %v70_v28 = vld [vmem:[#allocation5 + $0x98] sm:$0xff]  ;;  %v67_v30 = vld [vmem:[#allocation5 + $0x80] sm:$0xff] }
  0x2c   :  { %1967 = vmatprep.subr.bf16.mxu1 %v1966_v18  ;;  %v1938_v27 = vpack.c.bf16 %v72_v25, %v68_v24  ;;  %v74_v29 = vld [vmem:[#allocation5 + $0xb8] sm:$0xff]  ;;  %v71_v32 = vld [vmem:[#allocation5 + $0xa0] sm:$0xff]  ;;  %v69_v33 = vld [vmem:[#allocation5 + $0x90] sm:$0xff] }
  0x2d   :  { %v1970_v31 = vpack.c.bf16 %v74_v29, %v70_v28  ;;  %v73_v34 = vld [vmem:[#allocation5 + $0xb0] sm:$0xff]  ;;  %v1940_v35 = vpack.c.bf16 %v71_v32, %v67_v30  ;;  %v76_v36 = vld [vmem:[#allocation5 + $0xc8] sm:$0xff]  ;;  %v78_v38 = vld [vmem:[#allocation5 + $0xd8] sm:$0xff] }
  0x2e   :  { %1937 = vmatpush1.bf16.msra.mxu0 %v1936_v22  ;;  %v80_v37 = vld [vmem:[#allocation5 + $0xe8] sm:$0xff]  ;;  %v1972_v39 = vpack.c.bf16 %v73_v34, %v69_v33  ;;  %v82_v41 = vld [vmem:[#allocation5 + $0xf8] sm:$0xff]  ;;  %v75_v42 = vld [vmem:[#allocation5 + $0xc0] sm:$0xff] }
  0x2f   :  { %1969 = vmatpush1.bf16.msra.mxu1 %v1968_v26  ;;  %1939 = vmatprep.subr.bf16.mxu0 %v1938_v27  ;;  %v1942_v40 = vpack.c.bf16 %v80_v37, %v76_v36  ;;  %v79_v43 = vld [vmem:[#allocation5 + $0xe0] sm:$0xff]  ;;  %v1974_v44 = vpack.c.bf16 %v82_v41, %v78_v38  ;;  %v77_v45 = vld [vmem:[#allocation5 + $0xd0] sm:$0xff]  ;;  %v84_v47 = vld [vmem:[#allocation5 + $0x108] sm:$0xff] }
  0x30   :  { %1971 = vmatprep.subr.bf16.mxu1 %v1970_v31  ;;  %v81_v46 = vld [vmem:[#allocation5 + $0xf0] sm:$0xff]  ;;  %v88_v48 = vld [vmem:[#allocation5 + $0x128] sm:$0xff]  ;;  %v86_v49 = vld [vmem:[#allocation5 + $0x118] sm:$0xff]  ;;  %v1944_v51 = vpack.c.bf16 %v79_v43, %v75_v42 }
  0x31   :  { %v90_v50 = vld [vmem:[#allocation5 + $0x138] sm:$0xff]  ;;  %v1976_v52 = vpack.c.bf16 %v81_v46, %v77_v45  ;;  %v1946_v53 = vpack.c.bf16 %v88_v48, %v84_v47  ;;  %v83_v54 = vld [vmem:[#allocation5 + $0x100] sm:$0xff]  ;;  %v85_v56 = vld [vmem:[#allocation5 + $0x110] sm:$0xff] }
  0x32   :  { %1941 = vmatpush1.bf16.msra.mxu0 %v1940_v35  ;;  %v87_v55 = vld [vmem:[#allocation5 + $0x120] sm:$0xff]  ;;  %v1978_v57 = vpack.c.bf16 %v90_v50, %v86_v49  ;;  %v89_v58 = vld [vmem:[#allocation5 + $0x130] sm:$0xff]  ;;  %v92_v59 = vld [vmem:[#allocation5 + $0x148] sm:$0xff] }
  0x33   :  { %1973 = vmatpush1.bf16.msra.mxu1 %v1972_v39  ;;  %1943 = vmatprep.subr.bf16.mxu0 %v1942_v40  ;;  %v96_v60 = vld [vmem:[#allocation5 + $0x168] sm:$0xff]  ;;  %v94_v61 = vld [vmem:[#allocation5 + $0x158] sm:$0xff]  ;;  %v1948_v63 = vpack.c.bf16 %v87_v55, %v83_v54  ;;  %v1980_v1 = vpack.c.bf16 %v89_v58, %v85_v56  ;;  %v91_v3 = vld [vmem:[#allocation5 + $0x140] sm:$0xff] }
  0x34   :  { %1975 = vmatprep.subr.bf16.mxu1 %v1974_v44  ;;  %v98_v62 = vld [vmem:[#allocation5 + $0x178] sm:$0xff]  ;;  %v1950_v2 = vpack.c.bf16 %v96_v60, %v92_v59  ;;  %v95_v4 = vld [vmem:[#allocation5 + $0x160] sm:$0xff]  ;;  %v93_v5 = vld [vmem:[#allocation5 + $0x150] sm:$0xff] }
  0x35   :  { %v1982_v6 = vpack.c.bf16 %v98_v62, %v94_v61  ;;  %v97_v7 = vld [vmem:[#allocation5 + $0x170] sm:$0xff]  ;;  %v100_v8 = vld [vmem:[#allocation5 + $0x188] sm:$0xff]  ;;  %v102_v10 = vld [vmem:[#allocation5 + $0x198] sm:$0xff]  ;;  %v1952_v12 = vpack.c.bf16 %v95_v4, %v91_v3 }
  0x36   :  { %1945 = vmatpush1.bf16.msra.mxu0 %v1944_v51  ;;  %v104_v9 = vld [vmem:[#allocation5 + $0x1a8] sm:$0xff]  ;;  %v106_v11 = vld [vmem:[#allocation5 + $0x1b8] sm:$0xff]  ;;  %v1984_v13 = vpack.c.bf16 %v97_v7, %v93_v5  ;;  %v99_v15 = vld [vmem:[#allocation5 + $0x180] sm:$0xff] }
  0x37   :  { %1977 = vmatpush1.bf16.msra.mxu1 %v1976_v52  ;;  %1947 = vmatprep.subr.bf16.mxu0 %v1946_v53  ;;  %v1954_v14 = vpack.c.bf16 %v104_v9, %v100_v8  ;;  %v103_v16 = vld [vmem:[#allocation5 + $0x1a0] sm:$0xff]  ;;  %v101_v17 = vld [vmem:[#allocation5 + $0x190] sm:$0xff]  ;;  %v1986_v18 = vpack.c.bf16 %v106_v11, %v102_v10  ;;  %v108_v20 = vld [vmem:[#allocation5 + $0x1c8] sm:$0xff] }
  0x38   :  { %1979 = vmatprep.subr.bf16.mxu1 %v1978_v57  ;;  %v105_v19 = vld [vmem:[#allocation5 + $0x1b0] sm:$0xff]  ;;  %v112_v21 = vld [vmem:[#allocation5 + $0x1e8] sm:$0xff]  ;;  %v110_v22 = vld [vmem:[#allocation5 + $0x1d8] sm:$0xff]  ;;  %v1956_v24 = vpack.c.bf16 %v103_v16, %v99_v15 }
  0x39   :  { %v114_v23 = vld [vmem:[#allocation5 + $0x1f8] sm:$0xff]  ;;  %v1988_v25 = vpack.c.bf16 %v105_v19, %v101_v17  ;;  %v1958_v26 = vpack.c.bf16 %v112_v21, %v108_v20  ;;  %v107_v27 = vld [vmem:[#allocation5 + $0x1c0] sm:$0xff]  ;;  %v109_v29 = vld [vmem:[#allocation5 + $0x1d0] sm:$0xff] }
  0x3a   :  { %1949 = vmatpush1.bf16.msra.mxu0 %v1948_v63  ;;  %v111_v28 = vld [vmem:[#allocation5 + $0x1e0] sm:$0xff]  ;;  %v1990_v30 = vpack.c.bf16 %v114_v23, %v110_v22  ;;  %v113_v31 = vld [vmem:[#allocation5 + $0x1f0] sm:$0xff]  ;;  %v116_v32 = vld [vmem:[#allocation7 + $0x8] sm:$0xff] }
  0x3b   :  { %1981 = vmatpush1.bf16.msra.mxu1 %v1980_v1  ;;  %1951 = vmatprep.subr.bf16.mxu0 %v1950_v2  ;;  %v120_v33 = vld [vmem:[#allocation7 + $0x28] sm:$0xff]  ;;  %v118_v34 = vld [vmem:[#allocation7 + $0x18] sm:$0xff]  ;;  %v1960_v36 = vpack.c.bf16 %v111_v28, %v107_v27  ;;  %v1992_v37 = vpack.c.bf16 %v113_v31, %v109_v29  ;;  %v115_v39 = vld [vmem:[#allocation7] sm:$0xff] }
  0x3c   :  { %1983 = vmatprep.subr.bf16.mxu1 %v1982_v6  ;;  %v122_v35 = vld [vmem:[#allocation7 + $0x38] sm:$0xff]  ;;  %v2823_v38 = vpack.c.bf16 %v120_v33, %v116_v32  ;;  %v119_v40 = vld [vmem:[#allocation7 + $0x20] sm:$0xff]  ;;  %v117_v42 = vld [vmem:[#allocation7 + $0x10] sm:$0xff] }
  0x3d   :  { %v2825_v41 = vpack.c.bf16 %v122_v35, %v118_v34  ;;  %v121_v43 = vld [vmem:[#allocation7 + $0x30] sm:$0xff]  ;;  %v124_v44 = vld [vmem:[#allocation7 + $0x48] sm:$0xff]  ;;  %v180_v46 = vld [vmem:[%s3290_s0] sm:$0xff]  ;;  %v2830_v47 = vpack.c.bf16 %v119_v40, %v115_v39 }
  0x3e   :  { %1953 = vmatpush1.bf16.msra.mxu0 %v1952_v12  ;;  %v128_v45 = vld [vmem:[#allocation7 + $0x68] sm:$0xff]  ;;  %v126_v48 = vld [vmem:[#allocation7 + $0x58] sm:$0xff]  ;;  %v2833_v50 = vpack.c.bf16 %v121_v43, %v117_v42  ;;  %v123_v51 = vld [vmem:[#allocation7 + $0x40] sm:$0xff] }
  0x3f   :  { %1985 = vmatpush1.bf16.msra.mxu1 %v1984_v13  ;;  %1955 = vmatprep.subr.bf16.mxu0 %v1954_v14  ;;  %v130_v49 = vld [vmem:[#allocation7 + $0x78] sm:$0xff]  ;;  %v127_v52 = vld [vmem:[#allocation7 + $0x60] sm:$0xff]  ;;  %v2836_v53 = vpack.c.bf16 %v128_v45, %v124_v44  ;;  %v125_v54 = vld [vmem:[#allocation7 + $0x50] sm:$0xff] }
  0x40   :  { %1987 = vmatprep.subr.bf16.mxu1 %v1986_v18  ;;  %v129_v55 = vld [vmem:[#allocation7 + $0x70] sm:$0xff]  ;;  %v2838_v56 = vpack.c.bf16 %v130_v49, %v126_v48  ;;  %v132_v57 = vld [vmem:[#allocation7 + $0x88] sm:$0xff]  ;;  %v2844_v60 = vpack.c.bf16 %v127_v52, %v123_v51  ;;  %v134_v61 = vld [vmem:[#allocation7 + $0x98] sm:$0xff] }
  0x41   :  { %v136_v58 = vld [vmem:[#allocation7 + $0xa8] sm:$0xff]  ;;  %v138_v62 = vld [vmem:[#allocation7 + $0xb8] sm:$0xff]  ;;  %v2848_v63 = vpack.c.bf16 %v129_v55, %v125_v54  ;;  %v131_v1 = vld [vmem:[#allocation7 + $0x80] sm:$0xff] }
  0x42   :  { %1957 = vmatpush1.bf16.msra.mxu0 %v1956_v24  ;;  %v181_v59 = vld [vmem:[%s3290_s0 + $0x8] sm:$0xff]  ;;  %v135_v2 = vld [vmem:[#allocation7 + $0xa0] sm:$0xff]  ;;  %v2852_v3 = vpack.c.bf16 %v136_v58, %v132_v57  ;;  %v133_v4 = vld [vmem:[#allocation7 + $0x90] sm:$0xff]  ;;  %v2855_v6 = vpack.c.bf16 %v138_v62, %v134_v61 }
  0x43   :  { %1989 = vmatpush1.bf16.msra.mxu1 %v1988_v25  ;;  %1959 = vmatprep.subr.bf16.mxu0 %v1958_v26  ;;  %v137_v5 = vld [vmem:[#allocation7 + $0xb0] sm:$0xff]  ;;  %v140_v7 = vld [vmem:[#allocation7 + $0xc8] sm:$0xff]  ;;  %v2861_v10 = vpack.c.bf16 %v135_v2, %v131_v1  ;;  %v142_v11 = vld [vmem:[#allocation7 + $0xd8] sm:$0xff] }
  0x44   :  { %1991 = vmatprep.subr.bf16.mxu1 %v1990_v30  ;;  %v144_v8 = vld [vmem:[#allocation7 + $0xe8] sm:$0xff]  ;;  %v182_v9 = vld [vmem:[%s3290_s0 + $0x10] sm:$0xff]  ;;  %v146_v12 = vld [vmem:[#allocation7 + $0xf8] sm:$0xff]  ;;  %v2865_v13 = vpack.c.bf16 %v137_v5, %v133_v4 }
  0x45   :  { %v139_v14 = vld [vmem:[#allocation7 + $0xc0] sm:$0xff]  ;;  %v2869_v16 = vpack.c.bf16 %v144_v8, %v140_v7  ;;  %v141_v17 = vld [vmem:[#allocation7 + $0xd0] sm:$0xff]  ;;  %v2872_v19 = vpack.c.bf16 %v146_v12, %v142_v11  ;;  %v148_v20 = vld [vmem:[#allocation7 + $0x108] sm:$0xff] }
  0x46   :  { %1961 = vmatpush1.bf16.msra.mxu0 %v1960_v36  ;;  %v143_v15 = vld [vmem:[#allocation7 + $0xe0] sm:$0xff]  ;;  %v145_v18 = vld [vmem:[#allocation7 + $0xf0] sm:$0xff]  ;;  %v152_v21 = vld [vmem:[#allocation7 + $0x128] sm:$0xff] }
  0x47   :  { %1993 = vmatpush1.bf16.msra.mxu1 %v1992_v37  ;;  %1995 = vmatprep.subr.bf16.mxu0 %v2823_v38  ;;  %v183_v22 = vld [vmem:[%s3290_s0 + $0x18] sm:$0xff]  ;;  %v2878_v23 = vpack.c.bf16 %v143_v15, %v139_v14  ;;  %v2882_v26 = vpack.c.bf16 %v145_v18, %v141_v17  ;;  %v147_v27 = vld [vmem:[#allocation7 + $0x100] sm:$0xff]  ;;  %v2886_v29 = vpack.c.bf16 %v152_v21, %v148_v20  ;;  %v149_v30 = vld [vmem:[#allocation7 + $0x110] sm:$0xff] }
  0x48   :  { %2027 = vmatprep.subr.bf16.mxu1 %v2825_v41  ;;  %v150_v24 = vld [vmem:[#allocation7 + $0x118] sm:$0xff]  ;;  %v151_v28 = vld [vmem:[#allocation7 + $0x120] sm:$0xff]  ;;  %v153_v31 = vld [vmem:[#allocation7 + $0x130] sm:$0xff] }
  0x49   :  { %274 = vmatmul.mubr.f32.vlgmr.msra.gmra.mrb[0].mxu0 %v180_v46  ;;  %v154_v25 = vld [vmem:[#allocation7 + $0x138] sm:$0xff]  ;;  %v156_v33 = vld [vmem:[#allocation7 + $0x148] sm:$0xff]  ;;  %v184_v35 = vld [vmem:[%s3290_s0 + $0x20] sm:$0xff]  ;;  %v2895_v36 = vpack.c.bf16 %v151_v28, %v147_v27  ;;  %v2899_v40 = vpack.c.bf16 %v153_v31, %v149_v30  ;;  %v189_v28 = vlaneseq }
  0x4a   :  { %387 = vmatmul.mubr.f32.vlgmr.msra.gmra.mrb[0].mxu1 %v180_v46  ;;  %1997 = vmatpush1.bf16.msra.mxu0 %v2830_v47  ;;  %v2889_v32 = vpack.c.bf16 %v154_v25, %v150_v24  ;;  %v160_v34 = vld [vmem:[#allocation7 + $0x168] sm:$0xff]  ;;  %v158_v37 = vld [vmem:[#allocation7 + $0x158] sm:$0xff]  ;;  %v155_v42 = vld [vmem:[#allocation7 + $0x140] sm:$0xff] }
  0x4b   :  { %2029 = vmatpush1.bf16.msra.mxu1 %v2833_v50  ;;  %279 = vmatprep.mubr.f32.mxu0 %v2771_v0  ;;  %v162_v39 = vld [vmem:[#allocation7 + $0x178] sm:$0xff]  ;;  %v159_v43 = vld [vmem:[#allocation7 + $0x160] sm:$0xff]  ;;  %v2903_v44 = vpack.c.bf16 %v160_v34, %v156_v33  ;;  %v157_v45 = vld [vmem:[#allocation7 + $0x150] sm:$0xff]  ;;  %v190_v30 = vshrl.u32 %v189_v28, 7 }
  0x4c   :  { %392 = vmatprep.mubr.f32.mxu1 %v2771_v0  ;;  %1999 = vmatprep.subr.bf16.mxu0 %v2836_v53  ;;  %v161_v46 = vld [vmem:[#allocation7 + $0x170] sm:$0xff]  ;;  %v2906_v48 = vpack.c.bf16 %v162_v39, %v158_v37  ;;  %v164_v49 = vld [vmem:[#allocation7 + $0x188] sm:$0xff]  ;;  %v2912_v54 = vpack.c.bf16 %v159_v43, %v155_v42  ;;  %v166_v55 = vld [vmem:[#allocation7 + $0x198] sm:$0xff] }
  0x4d   :  { %280 = vmatmul.mubr.f32.gmra.mrb[2].mxu0 %v181_v59  ;;  %2031 = vmatprep.subr.bf16.mxu1 %v2838_v56  ;;  %v168_v51 = vld [vmem:[#allocation7 + $0x1a8] sm:$0xff]  ;;  %v170_v57 = vld [vmem:[#allocation7 + $0x1b8] sm:$0xff]  ;;  %v2916_v58 = vpack.c.bf16 %v161_v46, %v157_v45  ;;  %v167_v61 = vld [vmem:[#allocation7 + $0x1a0] sm:$0xff]  ;;  %v191_v31 = vsub.s32 0, %v190_v30  ;;  %v195_v34 = vsub.s32 1, %v190_v30  ;;  %v203_v42 = vsub.s32 3, %v190_v30 }
  0x4e   :  { %393 = vmatmul.mubr.f32.gmra.mrb[2].mxu1 %v181_v59  ;;  %2001 = vmatpush1.bf16.msra.mxu0 %v2844_v60  ;;  %v185_v52 = vld [vmem:[%s3290_s0 + $0x28] sm:$0xff]  ;;  %v163_v59 = vld [vmem:[#allocation7 + $0x180] sm:$0xff]  ;;  %v2920_v62 = vpack.c.bf16 %v168_v51, %v164_v49  ;;  %v165_v1 = vld [vmem:[#allocation7 + $0x190] sm:$0xff]  ;;  %v2923_v4 = vpack.c.bf16 %v170_v57, %v166_v55 }
  0x4f   :  { %2033 = vmatpush1.bf16.msra.mxu1 %v2848_v63  ;;  %285 = vmatprep.mubr.f32.mxu0 %v2771_v0  ;;  %v169_v2 = vld [vmem:[#allocation7 + $0x1b0] sm:$0xff]  ;;  %v172_v5 = vld [vmem:[#allocation7 + $0x1c8] sm:$0xff]  ;;  %v174_v11 = vld [vmem:[#allocation7 + $0x1d8] sm:$0xff] }
  0x50   :  { %398 = vmatprep.mubr.f32.mxu1 %v2771_v0  ;;  %2003 = vmatprep.subr.bf16.mxu0 %v2852_v3  ;;  %v176_v7 = vld [vmem:[#allocation7 + $0x1e8] sm:$0xff]  ;;  %v186_v8 = vld [vmem:[%s3290_s0 + $0x30] sm:$0xff]  ;;  %v178_v12 = vld [vmem:[#allocation7 + $0x1f8] sm:$0xff]  ;;  %v2933_v14 = vpack.c.bf16 %v169_v2, %v165_v1 }
  0x51   :  { %286 = vmatmul.mubr.f32.gmra.mrb[4].mxu0 %v182_v9  ;;  %2035 = vmatprep.subr.bf16.mxu1 %v2855_v6  ;;  %v171_v15 = vld [vmem:[#allocation7 + $0x1c0] sm:$0xff]  ;;  %v2937_v18 = vpack.c.bf16 %v176_v7, %v172_v5  ;;  %v173_v20 = vld [vmem:[#allocation7 + $0x1d0] sm:$0xff]  ;;  %v187_v24 = vld [vmem:[%s3290_s0 + $0x38] sm:$0xff] }
  0x52   :  { %399 = vmatmul.mubr.f32.gmra.mrb[4].mxu1 %v182_v9  ;;  %2005 = vmatpush1.bf16.msra.mxu0 %v2861_v10  ;;  %v2929_v9 = vpack.c.bf16 %v167_v61, %v163_v59  ;;  %v175_v17 = vld [vmem:[#allocation7 + $0x1e0] sm:$0xff]  ;;  %v177_v21 = vld [vmem:[#allocation7 + $0x1f0] sm:$0xff]  ;;  %v199_v59 = vsub.s32 2, %v190_v30 }
  0x53   :  { %2037 = vmatpush1.bf16.msra.mxu1 %v2865_v13  ;;  %291 = vmatprep.mubr.f32.mxu0 %v2771_v0  ;;  %v2946_v25 = vpack.c.bf16 %v175_v17, %v171_v15  ;;  %v2950_v27 = vpack.c.bf16 %v177_v21, %v173_v20  ;;  %v179_v33 = vld [vmem:[%s3293_s3] sm:$0xf] }
  0x54   :  { %404 = vmatprep.mubr.f32.mxu1 %v2771_v0  ;;  %2007 = vmatprep.subr.bf16.mxu0 %v2869_v16  ;;  %v3002_v37 = vrot.slane %v179_v33, %v195_v34  ;;  %v3006_v57 = vrot.slane %v179_v33, %v203_v42  ;;  %v3009_v1 = vrot.slane %v179_v33, %v199_v59 }
  0x55   :  { %292 = vmatmul.mubr.f32.gmra.mrb[6].mxu0 %v183_v22  ;;  %2039 = vmatprep.subr.bf16.mxu1 %v2872_v19 }
  0x56   :  { %405 = vmatmul.mubr.f32.gmra.mrb[6].mxu1 %v183_v22  ;;  %2009 = vmatpush1.bf16.msra.mxu0 %v2878_v23  ;;  %v2940_v22 = vpack.c.bf16 %v178_v12, %v174_v11 }
  0x57   :  { %2041 = vmatpush1.bf16.msra.mxu1 %v2882_v26  ;;  %297 = vmatprep.mubr.f32.mxu0 %v2771_v0 }
  0x58   :  { %410 = vmatprep.mubr.f32.mxu1 %v2771_v0  ;;  %2011 = vmatprep.subr.bf16.mxu0 %v2886_v29 }
  0x59   :  { %298 = vmatmul.mubr.f32.gmra.mrb[8].mxu0 %v184_v35  ;;  %2043 = vmatprep.subr.bf16.mxu1 %v2889_v32 }
  0x5a   :  { %411 = vmatmul.mubr.f32.gmra.mrb[8].mxu1 %v184_v35  ;;  %2013 = vmatpush1.bf16.msra.mxu0 %v2895_v36  ;;  %v3000_v35 = vrot.slane %v179_v33, %v191_v31 }
  0x5b   :  { %2045 = vmatpush1.bf16.msra.mxu1 %v2899_v40  ;;  %303 = vmatprep.mubr.f32.mxu0 %v2771_v0 }
  0x5c   :  { %416 = vmatprep.mubr.f32.mxu1 %v2771_v0  ;;  %2015 = vmatprep.subr.bf16.mxu0 %v2903_v44 }
  0x5d   :  { %304 = vmatmul.mubr.f32.gmra.mrb[10].mxu0 %v185_v52  ;;  %2047 = vmatprep.subr.bf16.mxu1 %v2906_v48 }
  0x5e   :  { %417 = vmatmul.mubr.f32.gmra.mrb[10].mxu1 %v185_v52  ;;  %2017 = vmatpush1.bf16.msra.mxu0 %v2912_v54 }
  0x5f   :  { %2049 = vmatpush1.bf16.msra.mxu1 %v2916_v58  ;;  %309 = vmatprep.mubr.f32.mxu0 %v2771_v0 }
  0x60   :  { %422 = vmatprep.mubr.f32.mxu1 %v2771_v0  ;;  %2019 = vmatprep.subr.bf16.mxu0 %v2920_v62 }
  0x61   :  { %310 = vmatmul.mubr.f32.gmra.mrb[12].mxu0 %v186_v8  ;;  %2051 = vmatprep.subr.bf16.mxu1 %v2923_v4 }
  0x62   :  { %423 = vmatmul.mubr.f32.gmra.mrb[12].mxu1 %v186_v8  ;;  %2021 = vmatpush1.bf16.msra.mxu0 %v2929_v9 }
  0x63   :  { %2053 = vmatpush1.bf16.msra.mxu1 %v2933_v14  ;;  %315 = vmatprep.mubr.f32.mxu0 %v2771_v0 }
  0x64   :  { %428 = vmatprep.mubr.f32.mxu1 %v2771_v0  ;;  %2023 = vmatprep.subr.bf16.mxu0 %v2937_v18 }
  0x65   :  { %316 = vmatmul.mubr.f32.gmra.mrb[14].mxu0 %v187_v24  ;;  %2055 = vmatprep.subr.bf16.mxu1 %v2940_v22 }
  0x66   :  { %429 = vmatmul.mubr.f32.gmra.mrb[14].mxu1 %v187_v24  ;;  %2025 = vmatpush1.bf16.msra.mxu0 %v2946_v25 }
  0x67   :  { %2057 = vmatpush1.bf16.msra.mxu1 %v2950_v27  ;;  %537 = vmatprep.mubr.f32.mxu0 %v2771_v0 }
  0x68   :  { %608 = vmatprep.mubr.f32.mxu1 %v2771_v0  ;;  %2059 = vmatprep.subr.bf16.mxu0 %v2823_v38 }
  0x69   :  { %538 = vmatmul.mubr.f32.vlgmr.msra.gmra.mrb[0].mxu0 %v2771_v0  ;;  %2091 = vmatprep.subr.bf16.mxu1 %v2825_v41 }
  0x6a   :  { %609 = vmatmul.mubr.f32.vlgmr.msra.gmra.mrb[0].mxu1 %v2771_v0  ;;  %2061 = vmatpush1.bf16.msra.mxu0 %v2830_v47 }
  0x6b   :  { %2093 = vmatpush1.bf16.msra.mxu1 %v2833_v50  ;;  %2063 = vmatprep.subr.bf16.mxu0 %v2836_v53 }
  0x6c   :  { %2095 = vmatprep.subr.bf16.mxu1 %v2838_v56  ;;  %714 = vmatprep.mubr.f32.mxu0 %v2771_v0 }
  0x6d   :  { %785 = vmatprep.mubr.f32.mxu1 %v2771_v0 }
  0x6e   :  { %2065 = vmatpush1.bf16.msra.mxu0 %v2844_v60 }
  0x6f   :  { %2097 = vmatpush1.bf16.msra.mxu1 %v2848_v63  ;;  %2067 = vmatprep.subr.bf16.mxu0 %v2852_v3 }
  0x70   :  { %2099 = vmatprep.subr.bf16.mxu1 %v2855_v6 }
  0x72   :  { %2069 = vmatpush1.bf16.msra.mxu0 %v2861_v10 }
  0x73   :  { %2101 = vmatpush1.bf16.msra.mxu1 %v2865_v13  ;;  %2071 = vmatprep.subr.bf16.mxu0 %v2869_v16 }
  0x74   :  { %2103 = vmatprep.subr.bf16.mxu1 %v2872_v19 }
  0x76   :  { %2073 = vmatpush1.bf16.msra.mxu0 %v2878_v23 }
  0x77   :  { %2105 = vmatpush1.bf16.msra.mxu1 %v2882_v26  ;;  %2075 = vmatprep.subr.bf16.mxu0 %v2886_v29 }
  0x78   :  { %2107 = vmatprep.subr.bf16.mxu1 %v2889_v32 }
  0x7a   :  { %2077 = vmatpush1.bf16.msra.mxu0 %v2895_v36 }
  0x7b   :  { %2109 = vmatpush1.bf16.msra.mxu1 %v2899_v40  ;;  %2079 = vmatprep.subr.bf16.mxu0 %v2903_v44 }
  0x7c   :  { %2111 = vmatprep.subr.bf16.mxu1 %v2906_v48 }
  0x7e   :  { %2081 = vmatpush1.bf16.msra.mxu0 %v2912_v54 }
  0x7f   :  { %2113 = vmatpush1.bf16.msra.mxu1 %v2916_v58  ;;  %2083 = vmatprep.subr.bf16.mxu0 %v2920_v62 }
  0x80   :  { %2115 = vmatprep.subr.bf16.mxu1 %v2923_v4 }
  0x82   :  { %2085 = vmatpush1.bf16.msra.mxu0 %v2929_v9 }
  0x83   :  { %2117 = vmatpush1.bf16.msra.mxu1 %v2933_v14  ;;  %2087 = vmatprep.subr.bf16.mxu0 %v2937_v18 }
  0x84   :  { %2119 = vmatprep.subr.bf16.mxu1 %v2940_v22 }
  0x86   :  { %2089 = vmatpush1.bf16.msra.mxu0 %v2946_v25 }
  0x87   :  { %2121 = vmatpush1.bf16.msra.mxu1 %v2950_v27  ;;  %2123 = vmatprep.subr.bf16.mxu0 %v2823_v38 }
  0x88   :  { %2155 = vmatprep.subr.bf16.mxu1 %v2825_v41 }
 0x13c   :  { %v539_v39 = vpop.f32.mrb[0].mxu0 }
 0x13d   :  { %v2506_v43 = vadd.f32 %v539_v39, %v3000_v35  ;;  %v610_v45 = vpop.f32.mrb[0].mxu1  ;;  %v541_v46 = vpop.f32.mrb[1].mxu0 }
 0x13e   :  { %v2507_v49 = vadd.f32 %v541_v46, %v3002_v37  ;;  %v612_v51 = vpop.f32.mrb[1].mxu1  ;;  %v2522_v5 = vadd.f32 %v610_v45, %v3009_v1 }
 0x13f   :  { %v1899_v52 = vmul.f32 -1.442695, %v2506_v43  ;;  %v2523_v61 = vadd.f32 %v612_v51, %v3006_v57 }
 0x140   :  { %v1900_v55 = vmul.f32 -1.442695, %v2507_v49 }
 0x141   :  { %2575 = vpow2.f32 %v1899_v52  ;;  %v1901_v2 = vmul.f32 -1.442695, %v2523_v61 }
 0x142   :  { %2577 = vpow2.f32 %v1900_v55 }
 0x143   :  { %2579 = vpow2.f32 %v1901_v2 }
 0x144   :  { %2581 = vtanh.f32 %v2522_v5 }
 0x14b   :  { %v2576_v7 = vpop.eup %2575 }
 0x14c   :  { %v2578_v8 = vpop.eup %2577  ;;  %v622_v11 = vadd.f32 1.0, %v2576_v7 }
 0x14d   :  { %v628_v12 = vadd.f32 1.0, %v2578_v8  ;;  %v2580_v15 = vpop.eup %2579 }
 0x14e   :  { %2583 = vrcp.f32 %v622_v11  ;;  %v2582_v17 = vpop.eup %2581  ;;  %v635_v28 = vadd.f32 1.0, %v2580_v15 }
 0x14f   :  { %2585 = vrcp.f32 %v628_v12 }
 0x150   :  { %2587 = vrcp.f32 %v635_v28 }
 0x158   :  { %v2584_v20 = vpop.eup %2583 }
 0x159   :  { %v2586_v21 = vpop.eup %2585  ;;  %v639_v24 = vmul.f32 %v2584_v20, %v2582_v17 }
 0x15a   :  { %v638_v30 = vmul.f32 0.0, %v2586_v21  ;;  %v2588_v33 = vpop.eup %2587 }
 0x15c   :  { %v3012_v31 = vadd.f32 %v639_v24, %v638_v30 }
 0x15e   :  { %2589 = vtanh.f32 %v3012_v31 }
 0x168   :  { %v2590_v34 = vpop.eup %2589 }
 0x169   :  { %v642_v39 = vmul.f32 %v2590_v34, %v2588_v33 }
 0x16b   :  { %2591 = vtanh.f32 %v642_v39  ;;  %715 = vmatmul.mubr.f32.vlgmr.msra.gmra.mrb[2].mxu0 %v642_v39  ;;  %786 = vmatmul.mubr.f32.vlgmr.msra.gmra.mrb[2].mxu1 %v642_v39 }
 0x16c   :  { %2125 = vmatpush1.bf16.msra.mxu0 %v2830_v47  ;;  %2157 = vmatpush1.bf16.msra.mxu1 %v2833_v50 }
 0x16d   :  { %2127 = vmatprep.subr.bf16.mxu0 %v2836_v53  ;;  %2159 = vmatprep.subr.bf16.mxu1 %v2838_v56 }
 0x16e   :  { %892 = vmatprep.mubr.f32.mxu0 %v2771_v0  ;;  %963 = vmatprep.mubr.f32.mxu1 %v2771_v0 }
 0x170   :  { %2129 = vmatpush1.bf16.msra.mxu0 %v2844_v60  ;;  %2161 = vmatpush1.bf16.msra.mxu1 %v2848_v63 }
 0x171   :  { %2131 = vmatprep.subr.bf16.mxu0 %v2852_v3  ;;  %2163 = vmatprep.subr.bf16.mxu1 %v2855_v6 }
 0x174   :  { %2133 = vmatpush1.bf16.msra.mxu0 %v2861_v10  ;;  %2165 = vmatpush1.bf16.msra.mxu1 %v2865_v13 }
 0x175   :  { %v2592_v42 = vpop.eup %2591  ;;  %2135 = vmatprep.subr.bf16.mxu0 %v2869_v16  ;;  %2167 = vmatprep.subr.bf16.mxu1 %v2872_v19 }
 0x176   :  { %644 = vst [vmem:[%s3294_s4] sm:$0xff] %v2592_v42 }
 0x178   :  { %2137 = vmatpush1.bf16.msra.mxu0 %v2878_v23  ;;  %2169 = vmatpush1.bf16.msra.mxu1 %v2882_v26 }
 0x179   :  { %2139 = vmatprep.subr.bf16.mxu0 %v2886_v29  ;;  %2171 = vmatprep.subr.bf16.mxu1 %v2889_v32 }
 0x17c   :  { %2141 = vmatpush1.bf16.msra.mxu0 %v2895_v36  ;;  %2173 = vmatpush1.bf16.msra.mxu1 %v2899_v40 }
 0x17d   :  { %2143 = vmatprep.subr.bf16.mxu0 %v2903_v44  ;;  %2175 = vmatprep.subr.bf16.mxu1 %v2906_v48 }
 0x180   :  { %2145 = vmatpush1.bf16.msra.mxu0 %v2912_v54  ;;  %2177 = vmatpush1.bf16.msra.mxu1 %v2916_v58 }
 0x181   :  { %2147 = vmatprep.subr.bf16.mxu0 %v2920_v62  ;;  %2179 = vmatprep.subr.bf16.mxu1 %v2923_v4 }
 0x184   :  { %2149 = vmatpush1.bf16.msra.mxu0 %v2929_v9  ;;  %2181 = vmatpush1.bf16.msra.mxu1 %v2933_v14 }
 0x185   :  { %2151 = vmatprep.subr.bf16.mxu0 %v2937_v18  ;;  %2183 = vmatprep.subr.bf16.mxu1 %v2940_v22 }
 0x188   :  { %2153 = vmatpush1.bf16.msra.mxu0 %v2946_v25  ;;  %2185 = vmatpush1.bf16.msra.mxu1 %v2950_v27 }
 0x189   :  { %2187 = vmatprep.subr.bf16.mxu0 %v2823_v38  ;;  %2219 = vmatprep.subr.bf16.mxu1 %v2825_v41 }
 0x23e   :  { %v716_v43 = vpop.f32.mrb[2].mxu0  ;;  %v787_v45 = vpop.f32.mrb[2].mxu1 }
 0x23f   :  { %v2508_v46 = vadd.f32 %v716_v43, %v3000_v35  ;;  %v718_v49 = vpop.f32.mrb[3].mxu0  ;;  %v789_v51 = vpop.f32.mrb[3].mxu1  ;;  %v2524_v5 = vadd.f32 %v787_v45, %v3009_v1 }
 0x240   :  { %v2509_v52 = vadd.f32 %v718_v49, %v3002_v37  ;;  %v2525_v61 = vadd.f32 %v789_v51, %v3006_v57 }
 0x241   :  { %v1902_v55 = vmul.f32 -1.442695, %v2508_v46 }
 0x242   :  { %v1903_v59 = vmul.f32 -1.442695, %v2509_v52  ;;  %v1904_v2 = vmul.f32 -1.442695, %v2525_v61 }
 0x243   :  { %2593 = vpow2.f32 %v1902_v55 }
 0x244   :  { %2595 = vpow2.f32 %v1903_v59 }
 0x245   :  { %2597 = vpow2.f32 %v1904_v2 }
 0x246   :  { %2599 = vtanh.f32 %v2524_v5 }
 0x24d   :  { %v2594_v7 = vpop.eup %2593 }
 0x24e   :  { %v2596_v8 = vpop.eup %2595  ;;  %v799_v11 = vadd.f32 1.0, %v2594_v7 }
 0x24f   :  { %v805_v12 = vadd.f32 1.0, %v2596_v8  ;;  %v2598_v15 = vpop.eup %2597 }
 0x250   :  { %2601 = vrcp.f32 %v799_v11  ;;  %v2600_v17 = vpop.eup %2599  ;;  %v812_v28 = vadd.f32 1.0, %v2598_v15 }
 0x251   :  { %2603 = vrcp.f32 %v805_v12 }
 0x252   :  { %2605 = vrcp.f32 %v812_v28 }
 0x25a   :  { %v2602_v20 = vpop.eup %2601 }
 0x25b   :  { %v2604_v21 = vpop.eup %2603  ;;  %v816_v24 = vmul.f32 %v2602_v20, %v2600_v17 }
 0x25c   :  { %v815_v30 = vmul.f32 %v2604_v21, %v3012_v31  ;;  %v2606_v34 = vpop.eup %2605 }
 0x25e   :  { %v3057_v33 = vadd.f32 %v816_v24, %v815_v30 }
 0x260   :  { %2607 = vtanh.f32 %v3057_v33 }
 0x26a   :  { %v2608_v39 = vpop.eup %2607 }
 0x26b   :  { %v819_v42 = vmul.f32 %v2608_v39, %v2606_v34 }
 0x26d   :  { %2609 = vtanh.f32 %v819_v42  ;;  %893 = vmatmul.mubr.f32.vlgmr.msra.gmra.mrb[4].mxu0 %v819_v42  ;;  %964 = vmatmul.mubr.f32.vlgmr.msra.gmra.mrb[4].mxu1 %v819_v42 }
 0x26e   :  { %2189 = vmatpush1.bf16.msra.mxu0 %v2830_v47  ;;  %2221 = vmatpush1.bf16.msra.mxu1 %v2833_v50 }
 0x26f   :  { %2191 = vmatprep.subr.bf16.mxu0 %v2836_v53  ;;  %2223 = vmatprep.subr.bf16.mxu1 %v2838_v56 }
 0x270   :  { %1070 = vmatprep.mubr.f32.mxu0 %v2771_v0  ;;  %1141 = vmatprep.mubr.f32.mxu1 %v2771_v0 }
 0x272   :  { %2193 = vmatpush1.bf16.msra.mxu0 %v2844_v60  ;;  %2225 = vmatpush1.bf16.msra.mxu1 %v2848_v63 }
 0x273   :  { %2195 = vmatprep.subr.bf16.mxu0 %v2852_v3  ;;  %2227 = vmatprep.subr.bf16.mxu1 %v2855_v6 }
 0x276   :  { %2197 = vmatpush1.bf16.msra.mxu0 %v2861_v10  ;;  %2229 = vmatpush1.bf16.msra.mxu1 %v2865_v13 }
 0x277   :  { %v2610_v31 = vpop.eup %2609  ;;  %2199 = vmatprep.subr.bf16.mxu0 %v2869_v16  ;;  %2231 = vmatprep.subr.bf16.mxu1 %v2872_v19 }
 0x278   :  { %1905 = vst [vmem:[%s3294_s4 + $0x8] sm:$0xff] %v2610_v31 }
 0x27a   :  { %2201 = vmatpush1.bf16.msra.mxu0 %v2878_v23  ;;  %2233 = vmatpush1.bf16.msra.mxu1 %v2882_v26 }
 0x27b   :  { %2203 = vmatprep.subr.bf16.mxu0 %v2886_v29  ;;  %2235 = vmatprep.subr.bf16.mxu1 %v2889_v32 }
 0x27e   :  { %2205 = vmatpush1.bf16.msra.mxu0 %v2895_v36  ;;  %2237 = vmatpush1.bf16.msra.mxu1 %v2899_v40 }
 0x27f   :  { %2207 = vmatprep.subr.bf16.mxu0 %v2903_v44  ;;  %2239 = vmatprep.subr.bf16.mxu1 %v2906_v48 }
 0x282   :  { %2209 = vmatpush1.bf16.msra.mxu0 %v2912_v54  ;;  %2241 = vmatpush1.bf16.msra.mxu1 %v2916_v58 }
 0x283   :  { %2211 = vmatprep.subr.bf16.mxu0 %v2920_v62  ;;  %2243 = vmatprep.subr.bf16.mxu1 %v2923_v4 }
 0x286   :  { %2213 = vmatpush1.bf16.msra.mxu0 %v2929_v9  ;;  %2245 = vmatpush1.bf16.msra.mxu1 %v2933_v14 }
 0x287   :  { %2215 = vmatprep.subr.bf16.mxu0 %v2937_v18  ;;  %2247 = vmatprep.subr.bf16.mxu1 %v2940_v22 }
 0x28a   :  { %2217 = vmatpush1.bf16.msra.mxu0 %v2946_v25  ;;  %2249 = vmatpush1.bf16.msra.mxu1 %v2950_v27 }
 0x28b   :  { %2251 = vmatprep.subr.bf16.mxu0 %v2823_v38  ;;  %2283 = vmatprep.subr.bf16.mxu1 %v2825_v41 }
 0x340   :  { %v894_v43 = vpop.f32.mrb[4].mxu0  ;;  %v965_v45 = vpop.f32.mrb[4].mxu1 }
 0x341   :  { %v2510_v46 = vadd.f32 %v894_v43, %v3000_v35  ;;  %v896_v49 = vpop.f32.mrb[5].mxu0  ;;  %v967_v51 = vpop.f32.mrb[5].mxu1  ;;  %v2526_v5 = vadd.f32 %v965_v45, %v3009_v1 }
 0x342   :  { %v2511_v52 = vadd.f32 %v896_v49, %v3002_v37  ;;  %v2527_v61 = vadd.f32 %v967_v51, %v3006_v57 }
 0x343   :  { %v1906_v55 = vmul.f32 -1.442695, %v2510_v46 }
 0x344   :  { %v1907_v59 = vmul.f32 -1.442695, %v2511_v52  ;;  %v1908_v2 = vmul.f32 -1.442695, %v2527_v61 }
 0x345   :  { %2611 = vpow2.f32 %v1906_v55 }
 0x346   :  { %2613 = vpow2.f32 %v1907_v59 }
 0x347   :  { %2615 = vpow2.f32 %v1908_v2 }
 0x348   :  { %2617 = vtanh.f32 %v2526_v5 }
 0x34f   :  { %v2612_v7 = vpop.eup %2611 }
 0x350   :  { %v2614_v8 = vpop.eup %2613  ;;  %v977_v11 = vadd.f32 1.0, %v2612_v7 }
 0x351   :  { %v983_v12 = vadd.f32 1.0, %v2614_v8  ;;  %v2616_v15 = vpop.eup %2615 }
 0x352   :  { %2619 = vrcp.f32 %v977_v11  ;;  %v2618_v17 = vpop.eup %2617  ;;  %v990_v28 = vadd.f32 1.0, %v2616_v15 }
 0x353   :  { %2621 = vrcp.f32 %v983_v12 }
 0x354   :  { %2623 = vrcp.f32 %v990_v28 }
 0x35c   :  { %v2620_v20 = vpop.eup %2619 }
 0x35d   :  { %v2622_v21 = vpop.eup %2621  ;;  %v994_v24 = vmul.f32 %v2620_v20, %v2618_v17 }
 0x35e   :  { %v993_v30 = vmul.f32 %v2622_v21, %v3057_v33  ;;  %v2624_v39 = vpop.eup %2623 }
 0x360   :  { %v3102_v34 = vadd.f32 %v994_v24, %v993_v30 }
 0x362   :  { %2625 = vtanh.f32 %v3102_v34 }
 0x36c   :  { %v2626_v42 = vpop.eup %2625 }
 0x36d   :  { %v997_v31 = vmul.f32 %v2626_v42, %v2624_v39 }
 0x36f   :  { %2627 = vtanh.f32 %v997_v31  ;;  %1071 = vmatmul.mubr.f32.vlgmr.msra.gmra.mrb[6].mxu0 %v997_v31  ;;  %1142 = vmatmul.mubr.f32.vlgmr.msra.gmra.mrb[6].mxu1 %v997_v31 }
 0x370   :  { %2253 = vmatpush1.bf16.msra.mxu0 %v2830_v47  ;;  %2285 = vmatpush1.bf16.msra.mxu1 %v2833_v50 }
 0x371   :  { %2255 = vmatprep.subr.bf16.mxu0 %v2836_v53  ;;  %2287 = vmatprep.subr.bf16.mxu1 %v2838_v56 }
 0x372   :  { %1248 = vmatprep.mubr.f32.mxu0 %v2771_v0  ;;  %1319 = vmatprep.mubr.f32.mxu1 %v2771_v0 }
 0x374   :  { %2257 = vmatpush1.bf16.msra.mxu0 %v2844_v60  ;;  %2289 = vmatpush1.bf16.msra.mxu1 %v2848_v63 }
 0x375   :  { %2259 = vmatprep.subr.bf16.mxu0 %v2852_v3  ;;  %2291 = vmatprep.subr.bf16.mxu1 %v2855_v6 }
 0x378   :  { %2261 = vmatpush1.bf16.msra.mxu0 %v2861_v10  ;;  %2293 = vmatpush1.bf16.msra.mxu1 %v2865_v13 }
 0x379   :  { %v2628_v33 = vpop.eup %2627  ;;  %2263 = vmatprep.subr.bf16.mxu0 %v2869_v16  ;;  %2295 = vmatprep.subr.bf16.mxu1 %v2872_v19 }
 0x37a   :  { %1909 = vst [vmem:[%s3294_s4 + $0x10] sm:$0xff] %v2628_v33 }
 0x37c   :  { %2265 = vmatpush1.bf16.msra.mxu0 %v2878_v23  ;;  %2297 = vmatpush1.bf16.msra.mxu1 %v2882_v26 }
 0x37d   :  { %2267 = vmatprep.subr.bf16.mxu0 %v2886_v29  ;;  %2299 = vmatprep.subr.bf16.mxu1 %v2889_v32 }
 0x380   :  { %2269 = vmatpush1.bf16.msra.mxu0 %v2895_v36  ;;  %2301 = vmatpush1.bf16.msra.mxu1 %v2899_v40 }
 0x381   :  { %2271 = vmatprep.subr.bf16.mxu0 %v2903_v44  ;;  %2303 = vmatprep.subr.bf16.mxu1 %v2906_v48 }
 0x384   :  { %2273 = vmatpush1.bf16.msra.mxu0 %v2912_v54  ;;  %2305 = vmatpush1.bf16.msra.mxu1 %v2916_v58 }
 0x385   :  { %2275 = vmatprep.subr.bf16.mxu0 %v2920_v62  ;;  %2307 = vmatprep.subr.bf16.mxu1 %v2923_v4 }
 0x388   :  { %2277 = vmatpush1.bf16.msra.mxu0 %v2929_v9  ;;  %2309 = vmatpush1.bf16.msra.mxu1 %v2933_v14 }
 0x389   :  { %2279 = vmatprep.subr.bf16.mxu0 %v2937_v18  ;;  %2311 = vmatprep.subr.bf16.mxu1 %v2940_v22 }
 0x38c   :  { %2281 = vmatpush1.bf16.msra.mxu0 %v2946_v25  ;;  %2313 = vmatpush1.bf16.msra.mxu1 %v2950_v27 }
 0x38d   :  { %2315 = vmatprep.subr.bf16.mxu0 %v2823_v38  ;;  %2347 = vmatprep.subr.bf16.mxu1 %v2825_v41 }
 0x442   :  { %v1072_v43 = vpop.f32.mrb[6].mxu0  ;;  %v1143_v45 = vpop.f32.mrb[6].mxu1 }
 0x443   :  { %v2512_v46 = vadd.f32 %v1072_v43, %v3000_v35  ;;  %v1074_v49 = vpop.f32.mrb[7].mxu0  ;;  %v1145_v51 = vpop.f32.mrb[7].mxu1  ;;  %v2528_v5 = vadd.f32 %v1143_v45, %v3009_v1 }
 0x444   :  { %v2513_v52 = vadd.f32 %v1074_v49, %v3002_v37  ;;  %v2529_v61 = vadd.f32 %v1145_v51, %v3006_v57 }
 0x445   :  { %v1910_v55 = vmul.f32 -1.442695, %v2512_v46 }
 0x446   :  { %v1911_v59 = vmul.f32 -1.442695, %v2513_v52  ;;  %v1912_v2 = vmul.f32 -1.442695, %v2529_v61 }
 0x447   :  { %2629 = vpow2.f32 %v1910_v55 }
 0x448   :  { %2631 = vpow2.f32 %v1911_v59 }
 0x449   :  { %2633 = vpow2.f32 %v1912_v2 }
 0x44a   :  { %2635 = vtanh.f32 %v2528_v5 }
 0x451   :  { %v2630_v7 = vpop.eup %2629 }
 0x452   :  { %v2632_v8 = vpop.eup %2631  ;;  %v1155_v11 = vadd.f32 1.0, %v2630_v7 }
 0x453   :  { %v1161_v12 = vadd.f32 1.0, %v2632_v8  ;;  %v2634_v15 = vpop.eup %2633 }
 0x454   :  { %2637 = vrcp.f32 %v1155_v11  ;;  %v2636_v17 = vpop.eup %2635  ;;  %v1168_v28 = vadd.f32 1.0, %v2634_v15 }
 0x455   :  { %2639 = vrcp.f32 %v1161_v12 }
 0x456   :  { %2641 = vrcp.f32 %v1168_v28 }
 0x45e   :  { %v2638_v20 = vpop.eup %2637 }
 0x45f   :  { %v2640_v21 = vpop.eup %2639  ;;  %v1172_v24 = vmul.f32 %v2638_v20, %v2636_v17 }
 0x460   :  { %v1171_v30 = vmul.f32 %v2640_v21, %v3102_v34  ;;  %v2642_v42 = vpop.eup %2641 }
 0x462   :  { %v3147_v39 = vadd.f32 %v1172_v24, %v1171_v30 }
 0x464   :  { %2643 = vtanh.f32 %v3147_v39 }
 0x46e   :  { %v2644_v31 = vpop.eup %2643 }
 0x46f   :  { %v1175_v33 = vmul.f32 %v2644_v31, %v2642_v42 }
 0x471   :  { %2645 = vtanh.f32 %v1175_v33  ;;  %1249 = vmatmul.mubr.f32.vlgmr.msra.gmra.mrb[8].mxu0 %v1175_v33  ;;  %1320 = vmatmul.mubr.f32.vlgmr.msra.gmra.mrb[8].mxu1 %v1175_v33 }
 0x472   :  { %2317 = vmatpush1.bf16.msra.mxu0 %v2830_v47  ;;  %2349 = vmatpush1.bf16.msra.mxu1 %v2833_v50 }
 0x473   :  { %2319 = vmatprep.subr.bf16.mxu0 %v2836_v53  ;;  %2351 = vmatprep.subr.bf16.mxu1 %v2838_v56 }
 0x474   :  { %1426 = vmatprep.mubr.f32.mxu0 %v2771_v0  ;;  %1497 = vmatprep.mubr.f32.mxu1 %v2771_v0 }
 0x476   :  { %2321 = vmatpush1.bf16.msra.mxu0 %v2844_v60  ;;  %2353 = vmatpush1.bf16.msra.mxu1 %v2848_v63 }
 0x477   :  { %2323 = vmatprep.subr.bf16.mxu0 %v2852_v3  ;;  %2355 = vmatprep.subr.bf16.mxu1 %v2855_v6 }
 0x47a   :  { %2325 = vmatpush1.bf16.msra.mxu0 %v2861_v10  ;;  %2357 = vmatpush1.bf16.msra.mxu1 %v2865_v13 }
 0x47b   :  { %v2646_v34 = vpop.eup %2645  ;;  %2327 = vmatprep.subr.bf16.mxu0 %v2869_v16  ;;  %2359 = vmatprep.subr.bf16.mxu1 %v2872_v19 }
 0x47c   :  { %1913 = vst [vmem:[%s3294_s4 + $0x18] sm:$0xff] %v2646_v34 }
 0x47e   :  { %2329 = vmatpush1.bf16.msra.mxu0 %v2878_v23  ;;  %2361 = vmatpush1.bf16.msra.mxu1 %v2882_v26 }
 0x47f   :  { %2331 = vmatprep.subr.bf16.mxu0 %v2886_v29  ;;  %2363 = vmatprep.subr.bf16.mxu1 %v2889_v32 }
 0x482   :  { %2333 = vmatpush1.bf16.msra.mxu0 %v2895_v36  ;;  %2365 = vmatpush1.bf16.msra.mxu1 %v2899_v40 }
 0x483   :  { %2335 = vmatprep.subr.bf16.mxu0 %v2903_v44  ;;  %2367 = vmatprep.subr.bf16.mxu1 %v2906_v48 }
 0x486   :  { %2337 = vmatpush1.bf16.msra.mxu0 %v2912_v54  ;;  %2369 = vmatpush1.bf16.msra.mxu1 %v2916_v58 }
 0x487   :  { %2339 = vmatprep.subr.bf16.mxu0 %v2920_v62  ;;  %2371 = vmatprep.subr.bf16.mxu1 %v2923_v4 }
 0x48a   :  { %2341 = vmatpush1.bf16.msra.mxu0 %v2929_v9  ;;  %2373 = vmatpush1.bf16.msra.mxu1 %v2933_v14 }
 0x48b   :  { %2343 = vmatprep.subr.bf16.mxu0 %v2937_v18  ;;  %2375 = vmatprep.subr.bf16.mxu1 %v2940_v22 }
 0x48e   :  { %2345 = vmatpush1.bf16.msra.mxu0 %v2946_v25  ;;  %2377 = vmatpush1.bf16.msra.mxu1 %v2950_v27 }
 0x48f   :  { %2379 = vmatprep.subr.bf16.mxu0 %v2823_v38  ;;  %2411 = vmatprep.subr.bf16.mxu1 %v2825_v41 }
 0x544   :  { %v1250_v43 = vpop.f32.mrb[8].mxu0  ;;  %v1321_v45 = vpop.f32.mrb[8].mxu1 }
 0x545   :  { %v2514_v46 = vadd.f32 %v1250_v43, %v3000_v35  ;;  %v1252_v49 = vpop.f32.mrb[9].mxu0  ;;  %v1323_v51 = vpop.f32.mrb[9].mxu1  ;;  %v2530_v5 = vadd.f32 %v1321_v45, %v3009_v1 }
 0x546   :  { %v2515_v52 = vadd.f32 %v1252_v49, %v3002_v37  ;;  %v2531_v61 = vadd.f32 %v1323_v51, %v3006_v57 }
 0x547   :  { %v1914_v55 = vmul.f32 -1.442695, %v2514_v46 }
 0x548   :  { %v1915_v59 = vmul.f32 -1.442695, %v2515_v52  ;;  %v1916_v2 = vmul.f32 -1.442695, %v2531_v61 }
 0x549   :  { %2647 = vpow2.f32 %v1914_v55 }
 0x54a   :  { %2649 = vpow2.f32 %v1915_v59 }
 0x54b   :  { %2651 = vpow2.f32 %v1916_v2 }
 0x54c   :  { %2653 = vtanh.f32 %v2530_v5 }
 0x553   :  { %v2648_v7 = vpop.eup %2647 }
 0x554   :  { %v2650_v8 = vpop.eup %2649  ;;  %v1333_v11 = vadd.f32 1.0, %v2648_v7 }
 0x555   :  { %v1339_v12 = vadd.f32 1.0, %v2650_v8  ;;  %v2652_v15 = vpop.eup %2651 }
 0x556   :  { %2655 = vrcp.f32 %v1333_v11  ;;  %v2654_v17 = vpop.eup %2653  ;;  %v1346_v28 = vadd.f32 1.0, %v2652_v15 }
 0x557   :  { %2657 = vrcp.f32 %v1339_v12 }
 0x558   :  { %2659 = vrcp.f32 %v1346_v28 }
 0x560   :  { %v2656_v20 = vpop.eup %2655 }
 0x561   :  { %v2658_v21 = vpop.eup %2657  ;;  %v1350_v24 = vmul.f32 %v2656_v20, %v2654_v17 }
 0x562   :  { %v1349_v30 = vmul.f32 %v2658_v21, %v3147_v39  ;;  %v2660_v31 = vpop.eup %2659 }
 0x564   :  { %v3192_v42 = vadd.f32 %v1350_v24, %v1349_v30 }
 0x566   :  { %2661 = vtanh.f32 %v3192_v42 }
 0x570   :  { %v2662_v33 = vpop.eup %2661 }
 0x571   :  { %v1353_v34 = vmul.f32 %v2662_v33, %v2660_v31 }
 0x573   :  { %2663 = vtanh.f32 %v1353_v34  ;;  %1427 = vmatmul.mubr.f32.vlgmr.msra.gmra.mrb[10].mxu0 %v1353_v34  ;;  %1498 = vmatmul.mubr.f32.vlgmr.msra.gmra.mrb[10].mxu1 %v1353_v34 }
 0x574   :  { %2381 = vmatpush1.bf16.msra.mxu0 %v2830_v47  ;;  %2413 = vmatpush1.bf16.msra.mxu1 %v2833_v50 }
 0x575   :  { %2383 = vmatprep.subr.bf16.mxu0 %v2836_v53  ;;  %2415 = vmatprep.subr.bf16.mxu1 %v2838_v56 }
 0x576   :  { %1604 = vmatprep.mubr.f32.mxu0 %v2771_v0  ;;  %1675 = vmatprep.mubr.f32.mxu1 %v2771_v0 }
 0x578   :  { %2385 = vmatpush1.bf16.msra.mxu0 %v2844_v60  ;;  %2417 = vmatpush1.bf16.msra.mxu1 %v2848_v63 }
 0x579   :  { %2387 = vmatprep.subr.bf16.mxu0 %v2852_v3  ;;  %2419 = vmatprep.subr.bf16.mxu1 %v2855_v6 }
 0x57c   :  { %2389 = vmatpush1.bf16.msra.mxu0 %v2861_v10  ;;  %2421 = vmatpush1.bf16.msra.mxu1 %v2865_v13 }
 0x57d   :  { %v2664_v39 = vpop.eup %2663  ;;  %2391 = vmatprep.subr.bf16.mxu0 %v2869_v16  ;;  %2423 = vmatprep.subr.bf16.mxu1 %v2872_v19 }
 0x57e   :  { %1917 = vst [vmem:[%s3294_s4 + $0x20] sm:$0xff] %v2664_v39 }
 0x580   :  { %2393 = vmatpush1.bf16.msra.mxu0 %v2878_v23  ;;  %2425 = vmatpush1.bf16.msra.mxu1 %v2882_v26 }
 0x581   :  { %2395 = vmatprep.subr.bf16.mxu0 %v2886_v29  ;;  %2427 = vmatprep.subr.bf16.mxu1 %v2889_v32 }
 0x584   :  { %2397 = vmatpush1.bf16.msra.mxu0 %v2895_v36  ;;  %2429 = vmatpush1.bf16.msra.mxu1 %v2899_v40 }
 0x585   :  { %2399 = vmatprep.subr.bf16.mxu0 %v2903_v44  ;;  %2431 = vmatprep.subr.bf16.mxu1 %v2906_v48 }
 0x588   :  { %2401 = vmatpush1.bf16.msra.mxu0 %v2912_v54  ;;  %2433 = vmatpush1.bf16.msra.mxu1 %v2916_v58 }
 0x589   :  { %2403 = vmatprep.subr.bf16.mxu0 %v2920_v62  ;;  %2435 = vmatprep.subr.bf16.mxu1 %v2923_v4 }
 0x58c   :  { %2405 = vmatpush1.bf16.msra.mxu0 %v2929_v9  ;;  %2437 = vmatpush1.bf16.msra.mxu1 %v2933_v14 }
 0x58d   :  { %2407 = vmatprep.subr.bf16.mxu0 %v2937_v18  ;;  %2439 = vmatprep.subr.bf16.mxu1 %v2940_v22 }
 0x590   :  { %2409 = vmatpush1.bf16.msra.mxu0 %v2946_v25  ;;  %2441 = vmatpush1.bf16.msra.mxu1 %v2950_v27 }
 0x591   :  { %2443 = vmatprep.subr.bf16.mxu0 %v2823_v38  ;;  %2475 = vmatprep.subr.bf16.mxu1 %v2825_v41 }
 0x646   :  { %v1428_v43 = vpop.f32.mrb[10].mxu0  ;;  %v1499_v45 = vpop.f32.mrb[10].mxu1 }
 0x647   :  { %v2516_v46 = vadd.f32 %v1428_v43, %v3000_v35  ;;  %v1430_v49 = vpop.f32.mrb[11].mxu0  ;;  %v1501_v51 = vpop.f32.mrb[11].mxu1  ;;  %v2532_v5 = vadd.f32 %v1499_v45, %v3009_v1 }
 0x648   :  { %v2517_v52 = vadd.f32 %v1430_v49, %v3002_v37  ;;  %v2533_v61 = vadd.f32 %v1501_v51, %v3006_v57 }
 0x649   :  { %v1918_v55 = vmul.f32 -1.442695, %v2516_v46 }
 0x64a   :  { %v1919_v59 = vmul.f32 -1.442695, %v2517_v52  ;;  %v1920_v2 = vmul.f32 -1.442695, %v2533_v61 }
 0x64b   :  { %2665 = vpow2.f32 %v1918_v55 }
 0x64c   :  { %2667 = vpow2.f32 %v1919_v59 }
 0x64d   :  { %2669 = vpow2.f32 %v1920_v2 }
 0x64e   :  { %2671 = vtanh.f32 %v2532_v5 }
 0x655   :  { %v2666_v38 = vpop.eup %2665 }
 0x656   :  { %v2668_v7 = vpop.eup %2667  ;;  %v1511_v41 = vadd.f32 1.0, %v2666_v38 }
 0x657   :  { %v1517_v8 = vadd.f32 1.0, %v2668_v7  ;;  %v2670_v11 = vpop.eup %2669 }
 0x658   :  { %2673 = vrcp.f32 %v1511_v41  ;;  %v2672_v12 = vpop.eup %2671  ;;  %v1524_v21 = vadd.f32 1.0, %v2670_v11 }
 0x659   :  { %2675 = vrcp.f32 %v1517_v8 }
 0x65a   :  { %2677 = vrcp.f32 %v1524_v21 }
 0x662   :  { %v2674_v15 = vpop.eup %2673 }
 0x663   :  { %v2676_v17 = vpop.eup %2675  ;;  %v1528_v20 = vmul.f32 %v2674_v15, %v2672_v12 }
 0x664   :  { %v1527_v24 = vmul.f32 %v2676_v17, %v3192_v42  ;;  %v2678_v30 = vpop.eup %2677 }
 0x666   :  { %v3237_v28 = vadd.f32 %v1528_v20, %v1527_v24 }
 0x668   :  { %2679 = vtanh.f32 %v3237_v28 }
 0x672   :  { %v2680_v31 = vpop.eup %2679 }
 0x673   :  { %v1531_v33 = vmul.f32 %v2680_v31, %v2678_v30 }
 0x675   :  { %2681 = vtanh.f32 %v1531_v33  ;;  %1605 = vmatmul.mubr.f32.vlgmr.msra.gmra.mrb[12].mxu0 %v1531_v33  ;;  %1676 = vmatmul.mubr.f32.vlgmr.msra.gmra.mrb[12].mxu1 %v1531_v33 }
 0x676   :  { %2445 = vmatpush1.bf16.msra.mxu0 %v2830_v47  ;;  %2477 = vmatpush1.bf16.msra.mxu1 %v2833_v50 }
 0x677   :  { %2447 = vmatprep.subr.bf16.mxu0 %v2836_v53  ;;  %2479 = vmatprep.subr.bf16.mxu1 %v2838_v56 }
 0x678   :  { %1782 = vmatprep.mubr.f32.mxu0 %v2771_v0  ;;  %1853 = vmatprep.mubr.f32.mxu1 %v2771_v0 }
 0x67a   :  { %2449 = vmatpush1.bf16.msra.mxu0 %v2844_v60  ;;  %2481 = vmatpush1.bf16.msra.mxu1 %v2848_v63 }
 0x67b   :  { %2451 = vmatprep.subr.bf16.mxu0 %v2852_v3  ;;  %2483 = vmatprep.subr.bf16.mxu1 %v2855_v6 }
 0x67e   :  { %2453 = vmatpush1.bf16.msra.mxu0 %v2861_v10  ;;  %2485 = vmatpush1.bf16.msra.mxu1 %v2865_v13 }
 0x67f   :  { %v2682_v47 = vpop.eup %2681  ;;  %2455 = vmatprep.subr.bf16.mxu0 %v2869_v16  ;;  %2487 = vmatprep.subr.bf16.mxu1 %v2872_v19 }
 0x680   :  { %1921 = vst [vmem:[%s3294_s4 + $0x28] sm:$0xff] %v2682_v47 }
 0x682   :  { %2457 = vmatpush1.bf16.msra.mxu0 %v2878_v23  ;;  %2489 = vmatpush1.bf16.msra.mxu1 %v2882_v26 }
 0x683   :  { %2459 = vmatprep.subr.bf16.mxu0 %v2886_v29  ;;  %2491 = vmatprep.subr.bf16.mxu1 %v2889_v32 }
 0x686   :  { %2461 = vmatpush1.bf16.msra.mxu0 %v2895_v36  ;;  %2493 = vmatpush1.bf16.msra.mxu1 %v2899_v40 }
 0x687   :  { %2463 = vmatprep.subr.bf16.mxu0 %v2903_v44  ;;  %2495 = vmatprep.subr.bf16.mxu1 %v2906_v48 }
 0x68a   :  { %2465 = vmatpush1.bf16.msra.mxu0 %v2912_v54  ;;  %2497 = vmatpush1.bf16.msra.mxu1 %v2916_v58 }
 0x68b   :  { %2467 = vmatprep.subr.bf16.mxu0 %v2920_v62  ;;  %2499 = vmatprep.subr.bf16.mxu1 %v2923_v4 }
 0x68e   :  { %2469 = vmatpush1.bf16.msra.mxu0 %v2929_v9  ;;  %2501 = vmatpush1.bf16.msra.mxu1 %v2933_v14 }
 0x68f   :  { %2471 = vmatprep.subr.bf16.mxu0 %v2937_v18  ;;  %2503 = vmatprep.subr.bf16.mxu1 %v2940_v22 }
 0x692   :  { %2473 = vmatpush1.bf16.msra.mxu0 %v2946_v25  ;;  %2505 = vmatpush1.bf16.msra.mxu1 %v2950_v27 }
 0x748   :  { %v1606_v0 = vpop.f32.mrb[12].mxu0  ;;  %v1677_v50 = vpop.f32.mrb[12].mxu1 }
 0x749   :  { %v2518_v53 = vadd.f32 %v1606_v0, %v3000_v35  ;;  %v1608_v56 = vpop.f32.mrb[13].mxu0  ;;  %v1679_v60 = vpop.f32.mrb[13].mxu1  ;;  %v2534_v16 = vadd.f32 %v1677_v50, %v3009_v1 }
 0x74a   :  { %v2519_v63 = vadd.f32 %v1608_v56, %v3002_v37  ;;  %v2535_v10 = vadd.f32 %v1679_v60, %v3006_v57 }
 0x74b   :  { %v1922_v3 = vmul.f32 -1.442695, %v2518_v53 }
 0x74c   :  { %v1923_v6 = vmul.f32 -1.442695, %v2519_v63  ;;  %v1924_v13 = vmul.f32 -1.442695, %v2535_v10 }
 0x74d   :  { %2683 = vpow2.f32 %v1922_v3 }
 0x74e   :  { %2685 = vpow2.f32 %v1923_v6 }
 0x74f   :  { %2687 = vpow2.f32 %v1924_v13 }
 0x750   :  { %2689 = vtanh.f32 %v2534_v16 }
 0x757   :  { %v2684_v19 = vpop.eup %2683 }
 0x758   :  { %v2686_v23 = vpop.eup %2685  ;;  %v1689_v26 = vadd.f32 1.0, %v2684_v19 }
 0x759   :  { %v1695_v29 = vadd.f32 1.0, %v2686_v23  ;;  %v2688_v32 = vpop.eup %2687 }
 0x75a   :  { %2691 = vrcp.f32 %v1689_v26  ;;  %v2690_v36 = vpop.eup %2689  ;;  %v1702_v54 = vadd.f32 1.0, %v2688_v32 }
 0x75b   :  { %2693 = vrcp.f32 %v1695_v29 }
 0x75c   :  { %2695 = vrcp.f32 %v1702_v54 }
 0x764   :  { %v2692_v40 = vpop.eup %2691 }
 0x765   :  { %v2694_v44 = vpop.eup %2693  ;;  %v1706_v48 = vmul.f32 %v2692_v40, %v2690_v36 }
 0x766   :  { %v1705_v58 = vmul.f32 %v2694_v44, %v3237_v28  ;;  %v2696_v4 = vpop.eup %2695 }
 0x768   :  { %v1707_v62 = vadd.f32 %v1706_v48, %v1705_v58 }
 0x76a   :  { %2697 = vtanh.f32 %v1707_v62 }
 0x774   :  { %v2698_v9 = vpop.eup %2697 }
 0x775   :  { %v1709_v14 = vmul.f32 %v2698_v9, %v2696_v4 }
 0x777   :  { %2699 = vtanh.f32 %v1709_v14  ;;  %1783 = vmatmul.mubr.f32.vlgmr.msra.gmra.mrb[14].mxu0 %v1709_v14  ;;  %1854 = vmatmul.mubr.f32.vlgmr.msra.gmra.mrb[14].mxu1 %v1709_v14 }
 0x781   :  { %v2700_v18 = vpop.eup %2699 }
 0x782   :  { %1925 = vst [vmem:[%s3294_s4 + $0x30] sm:$0xff] %v2700_v18 }
 0x84a   :  { %v1784_v22 = vpop.f32.mrb[14].mxu0  ;;  %v1855_v25 = vpop.f32.mrb[14].mxu1 }
 0x84b   :  { %v2520_v27 = vadd.f32 %v1784_v22, %v3000_v35  ;;  %v1786_v42 = vpop.f32.mrb[15].mxu0  ;;  %v1857_v34 = vpop.f32.mrb[15].mxu1  ;;  %v2536_v51 = vadd.f32 %v1855_v25, %v3009_v1 }
 0x84c   :  { %v2521_v39 = vadd.f32 %v1786_v42, %v3002_v37  ;;  %v2537_v46 = vadd.f32 %v1857_v34, %v3006_v57 }
 0x84d   :  { %v1926_v43 = vmul.f32 -1.442695, %v2520_v27 }
 0x84e   :  { %v1927_v45 = vmul.f32 -1.442695, %v2521_v39  ;;  %v1928_v49 = vmul.f32 -1.442695, %v2537_v46 }
 0x84f   :  { %2701 = vpow2.f32 %v1926_v43 }
 0x850   :  { %2703 = vpow2.f32 %v1927_v45 }
 0x851   :  { %2705 = vpow2.f32 %v1928_v49 }
 0x852   :  { %2707 = vtanh.f32 %v2536_v51 }
 0x859   :  { %v2702_v52 = vpop.eup %2701 }
 0x85a   :  { %v2704_v55 = vpop.eup %2703  ;;  %v1867_v59 = vadd.f32 1.0, %v2702_v52 }
 0x85b   :  { %v1873_v61 = vadd.f32 1.0, %v2704_v55  ;;  %v2706_v35 = vpop.eup %2705 }
 0x85c   :  { %2709 = vrcp.f32 %v1867_v59  ;;  %v2708_v2 = vpop.eup %2707  ;;  %v1880_v7 = vadd.f32 1.0, %v2706_v35 }
 0x85d   :  { %2711 = vrcp.f32 %v1873_v61 }
 0x85e   :  { %2713 = vrcp.f32 %v1880_v7 }
 0x866   :  { %v2710_v37 = vpop.eup %2709 }
 0x867   :  { %v2712_v5 = vpop.eup %2711  ;;  %v1884_v38 = vmul.f32 %v2710_v37, %v2708_v2 }
 0x868   :  { %v1883_v41 = vmul.f32 %v2712_v5, %v1707_v62  ;;  %v2714_v57 = vpop.eup %2713 }
 0x86a   :  { %v1885_v8 = vadd.f32 %v1884_v38, %v1883_v41 }
 0x86c   :  { %2715 = vtanh.f32 %v1885_v8 }
 0x876   :  { %v2716_v1 = vpop.eup %2715 }
 0x877   :  { %v1887_v11 = vmul.f32 %v2716_v1, %v2714_v57 }
 0x879   :  { %2717 = vtanh.f32 %v1887_v11 }
 0x883   :  { %v2718_v12 = vpop.eup %2717 }
 0x884   :  { %1929 = vst [vmem:[%s3294_s4 + $0x38] sm:$0xff] %v2718_v12 }
 0x885   :  { %1897 = vsyncpa [#allocation6], 1 }
 0x886   :  { %1898 = vsyncpa [#allocation8], 1 }

</bundles_post_ra>
